<compile_context>
chip_gen: v7x
topology: tpu7x:2x2x1
jax: 0.10.0
libtpu: 0.0.40
codegen_flags: <defaults>
</compile_context>

<pallas_src>
import functools
import math

import jax
import jax.numpy as jnp
from jax.experimental import pallas as pl
from jax.experimental.pallas import tpu as pltpu

# ----------------------------- configuration --------------------------------
N_IMG = 2            # batch size
C_IN = 3             # RGB input channels (length of pixel_mean / pixel_std)
H = W = 16           # image spatial size (already divisible -> no ImageList pad)
C_FEAT = 32          # backbone feature channels
NUM_CLASSES = 4      # foreground classes (roi head predicts NUM_CLASSES + 1)
TOPK = 8             # proposals kept per image
ANCHOR_SIZE = 4.0    # single square anchor per feature location (stride 1)
K_PAD = 32           # im2col contraction dim padded 27 -> 32
FEAT_PAD = 128       # lane-dense padded width for the feat output (32 -> 128)
HEAD_PAD = 128       # lane-dense padded width for the narrow head outputs
SCALE_CLAMP = math.log(1000.0 / 16.0)            # Detectron2 box-delta clamp
RPN_BOX_WEIGHTS = (1.0, 1.0, 1.0, 1.0)           # Detectron2 RPN transform
ROI_BOX_WEIGHTS = (10.0, 10.0, 5.0, 5.0)         # Detectron2 ROI-head transform


def _num_tensorcores() -> int:
    """2-way M split only pays on multi-TensorCore chips (v7x); on v5e/v6e the
    grid is a sequential loop and the extra step is pure per-step overhead."""
    try:
        kind = jax.devices()[0].device_kind.lower()
        if "v7" in kind:
            return 2
    except Exception:  # non-TPU backends / unexpected device strings
        pass
    return 1


# --------------------- Pallas kernel: backbone + RPN -------------------------
def _backbone_rpn_kernel(p_ref, bbw_ref, bbb_ref, rw_ref, rb_ref, hw_ref, hb_ref,
                         feat_ref, head_ref):
    # 3x3 conv as im2col matmul (normalization folded into weights/bias) + ReLU.
    # bb_w/bb_b are zero-padded on N (32 -> 128) so the feat store is a full
    # 128-lane unmasked vst; padded columns are exactly zero after ReLU.
    feat = jnp.dot(p_ref[...], bbw_ref[...], preferred_element_type=jnp.float32)
    feat = jnp.maximum(feat + bbb_ref[...], 0.0)
    feat_ref[...] = feat.astype(feat_ref.dtype)
    # RPN hidden 1x1 conv + ReLU (rpn_w K rows zero-padded 32 -> 128).
    hid = jnp.dot(feat, rw_ref[...], preferred_element_type=jnp.float32)
    hid = jnp.maximum(hid + rb_ref[...], 0.0)
    # RPN head (objectness + 4 deltas), zero-padded to 128 lanes -> unmasked stores.
    head = jnp.dot(hid, hw_ref[...], preferred_element_type=jnp.float32) + hb_ref[...]
    head_ref[...] = head.astype(head_ref.dtype)
    # TODO(synk): at realistic H*W, do the per-block objectness top-k inside this
    # kernel and emit only packed surviving rows, instead of streaming the full
    # (m, 128) head tensor (5/128 useful lanes) back to HBM.


def backbone_rpn(patches, bb_w, bb_b, rpn_w, rpn_b, head_w, head_b):
    m, k = patches.shape
    # Whole problem fits VMEM; split M in two only on 2-TC chips (v7x).
    # TODO(synk): when scaled past toy sizes, derive tm from a 64 MiB VMEM
    # budget (v7x) — 2x double-buffered (tm*K_PAD + tm*FEAT_PAD + tm*HEAD_PAD)
    # per step — not the 128 MiB v5e/v6e figure.
    split = _num_tensorcores() >= 2 and m >= 512 and (m // 2) % 8 == 0
    tm = m // 2 if split else m
    assert m % tm == 0
    grid = (m // tm,)
    return pl.pallas_call(
        _backbone_rpn_kernel,
        out_shape=(
            jax.ShapeDtypeStruct((m, FEAT_PAD), patches.dtype),
            jax.ShapeDtypeStruct((m, HEAD_PAD), patches.dtype),
        ),
        grid_spec=pl.GridSpec(
            grid=grid,
            in_specs=[
                pl.BlockSpec((tm, k), lambda i: (i, 0)),
                pl.BlockSpec((k, FEAT_PAD), lambda i: (0, 0)),
                pl.BlockSpec((1, FEAT_PAD), lambda i: (0, 0)),
                pl.BlockSpec((FEAT_PAD, C_FEAT), lambda i: (0, 0)),
                pl.BlockSpec((1, C_FEAT), lambda i: (0, 0)),
                pl.BlockSpec((C_FEAT, HEAD_PAD), lambda i: (0, 0)),
                pl.BlockSpec((1, HEAD_PAD), lambda i: (0, 0)),
            ],
            out_specs=[
                pl.BlockSpec((tm, FEAT_PAD), lambda i: (i, 0)),
                pl.BlockSpec((tm, HEAD_PAD), lambda i: (i, 0)),
            ],
        ),
        compiler_params=pltpu.CompilerParams(
            dimension_semantics=("parallel",) if split else ("arbitrary",),
            vmem_limit_bytes=32 * 1024 * 1024,
        ),
    )(patches, bb_w, bb_b, rpn_w, rpn_b, head_w, head_b)


# ------------------------------- glue (JAX) ----------------------------------
def im2col_3x3_mean_padded(x_nhwc, pixel_mean):
    """im2col on the RAW image, border padded with the per-channel pixel mean.

    With the normalization folded into the conv weights/bias, a mean-valued
    border is exactly equivalent to the original zero-padded conv on the
    normalized image.  K is padded 27 -> 32 for aligned MXU loads.
    """
    n, h, w, c = x_nhwc.shape
    xp = jnp.broadcast_to(pixel_mean.reshape(1, 1, 1, c).astype(x_nhwc.dtype),
                          (n, h + 2, w + 2, c))
    xp = xp.at[:, 1:h + 1, 1:w + 1, :].set(x_nhwc)
    patches = [xp[:, dy:dy + h, dx:dx + w, :] for dy in range(3) for dx in range(3)]
    pat = jnp.concatenate(patches, axis=-1).reshape(n * h * w, 9 * c)
    return jnp.pad(pat, ((0, 0), (0, K_PAD - 9 * c)))
    # TODO(synk): at realistic H/W move the im2col inside the Pallas kernel
    # (DMA the raw NHWC tile + 1-pixel halo into VMEM, 9 static shifted ref
    # slices -> accumulated matmuls) to avoid this 9x-expanded HBM tensor.


def make_anchors(h, w, size=ANCHOR_SIZE):
    ys, xs = jnp.meshgrid(
        jnp.arange(h, dtype=jnp.float32) + 0.5,
        jnp.arange(w, dtype=jnp.float32) + 0.5,
        indexing="ij",
    )
    cx, cy = xs.reshape(-1), ys.reshape(-1)
    half = size / 2.0
    return jnp.stack([cx - half, cy - half, cx + half, cy + half], axis=-1)


def apply_deltas(boxes, deltas, weights=RPN_BOX_WEIGHTS):
    wx, wy, ww, wh = weights
    wid = boxes[..., 2] - boxes[..., 0]
    hei = boxes[..., 3] - boxes[..., 1]
    ctr_x = boxes[..., 0] + 0.5 * wid
    ctr_y = boxes[..., 1] + 0.5 * hei
    dx = deltas[..., 0] / wx
    dy = deltas[..., 1] / wy
    dw = deltas[..., 2] / ww
    dh = deltas[..., 3] / wh
    dw = jnp.minimum(dw, SCALE_CLAMP)   # Detectron2 scale clamp
    dh = jnp.minimum(dh, SCALE_CLAMP)
    pcx = ctr_x + dx * wid
    pcy = ctr_y + dy * hei
    pw = wid * jnp.exp(dw)
    ph = hei * jnp.exp(dh)
    return jnp.stack(
        [pcx - 0.5 * pw, pcy - 0.5 * ph, pcx + 0.5 * pw, pcy + 0.5 * ph], axis=-1
    )


def post_process(boxes, img_h, img_w, out_h, out_w):
    """detector_postprocess: rescale boxes to the requested output size, clip."""
    scale = jnp.array(
        [out_w / img_w, out_h / img_h, out_w / img_w, out_h / img_h], boxes.dtype
    )
    hi = jnp.array([out_w, out_h, out_w, out_h], boxes.dtype)
    return jnp.clip(boxes * scale, 0.0, hi)


def prepare_fused_params(params):
    """Fold normalization into the backbone conv; lane-pad the narrow matmuls."""
    mean = params["pixel_mean"]
    inv_std = 1.0 / params["pixel_std"]
    row_scale = jnp.tile(inv_std, 9)[:, None]          # (27,1) per (tap,cin) row
    row_shift = jnp.tile(mean * inv_std, 9)[:, None]   # (27,1)
    bb_w = params["bb_w"]                              # (27, C_FEAT)
    bb_w_fold = bb_w * row_scale
    bb_b_fold = params["bb_b"] - jnp.sum(bb_w * row_shift, axis=0)
    # Pad K 27 -> 32 and N 32 -> 128 (lane-dense feat store).
    bb_w_fold = jnp.pad(
        bb_w_fold,
        ((0, K_PAD - bb_w_fold.shape[0]), (0, FEAT_PAD - bb_w_fold.shape[1])),
    )
    bb_b_fold = jnp.pad(bb_b_fold, (0, FEAT_PAD - bb_b_fold.shape[0]))

    # rpn_w: zero-pad K rows 32 -> 128 so feat_padded @ rpn_w is exact.
    rpn_w = jnp.pad(params["rpn_w"], ((0, FEAT_PAD - C_FEAT), (0, 0)))

    # RPN head: 5 -> 128 lane-dense padding.
    rpn_head_w = jnp.pad(params["rpn_head_w"], ((0, 0), (0, HEAD_PAD - 5)))
    rpn_head_b = jnp.pad(params["rpn_head_b"], (0, HEAD_PAD - 5))

    # TODO(synk): cast matmul-path weights/activations to bf16 (f32 accumulation,
    # f32 epilogue) once scaled to realistic H/W/C_FEAT; neutral at toy sizes.
    return {
        "bb_w": bb_w_fold,
        "bb_b": bb_b_fold.reshape(1, FEAT_PAD),
        "rpn_w": rpn_w,
        "rpn_b": params["rpn_b"].reshape(1, C_FEAT),
        "rpn_head_w": rpn_head_w,
        "rpn_head_b": rpn_head_b.reshape(1, HEAD_PAD),
    }


# ------------------------------- forward pass ---------------------------------
def inference(params, images_nchw, out_h, out_w):
    fused = prepare_fused_params(params)
    n, c, h, w = images_nchw.shape

    # preprocess_image: normalization is folded into the conv; ImageList
    # size-divisibility padding is a no-op at these shapes.
    x_nhwc = jnp.transpose(images_nchw, (0, 2, 3, 1))
    patches = im2col_3x3_mean_padded(x_nhwc, params["pixel_mean"])

    # Fused backbone + RPN Pallas kernel.
    feat_flat, rpn_head = backbone_rpn(
        patches, fused["bb_w"], fused["bb_b"],
        fused["rpn_w"], fused["rpn_b"],
        fused["rpn_head_w"], fused["rpn_head_b"])
    feat = feat_flat[:, :C_FEAT].reshape(n, h, w, C_FEAT)

    head = rpn_head.reshape(n, h * w, HEAD_PAD)
    obj = head[..., 0]
    deltas = head[..., 1:5]
    anchors = make_anchors(h, w)                                   # (h*w, 4)
    boxes = apply_deltas(anchors[None], deltas, RPN_BOX_WEIGHTS)   # (n, h*w, 4)
    _, topk_idx = jax.lax.top_k(obj, TOPK)                         # (n, TOPK)
    idx = jnp.broadcast_to(topk_idx[..., None], (n, TOPK, 4))
    proposals = jnp.take_along_axis(boxes, idx, axis=1)
    # TODO(synk): RPN NMS / score thresholding not implemented (no clean Pallas equivalent).

    # TODO(synk): ROIAlign bilinear sampling has no clean Pallas equivalent;
    #             nearest box-center feature pooling is used instead.
    k = proposals.shape[1]
    cx = jnp.clip(jnp.round((proposals[..., 0] + proposals[..., 2]) * 0.5), 0, w - 1)
    cy = jnp.clip(jnp.round((proposals[..., 1] + proposals[..., 3]) * 0.5), 0, h - 1)
    cx, cy = cx.astype(jnp.int32), cy.astype(jnp.int32)
    batch_idx = jnp.arange(n)[:, None]
    pooled = feat[batch_idx, cy, cx, :].reshape(n * k, C_FEAT)

    # Box head (fc + ReLU -> cls / reg) in plain JAX: at M = n*TOPK = 16 a
    # standalone pallas_call is pure launch overhead (perf review); XLA fuses
    # these two tiny dots + ReLU into the surrounding glue.
    hid = jnp.maximum(jnp.dot(pooled, params["box_fc_w"]) + params["box_fc_b"], 0.0)
    cls = jnp.dot(hid, params["cls_w"]) + params["cls_b"]
    reg = jnp.dot(hid, params["reg_w"]) + params["reg_b"]

    probs = jax.nn.softmax(cls, axis=-1)
    fg = probs[:, :NUM_CLASSES]
    pred_classes = jnp.argmax(fg, axis=-1)
    scores = jnp.max(fg, axis=-1)
    reg = reg.reshape(n * k, NUM_CLASSES, 4)
    sel_idx = jnp.broadcast_to(pred_classes[:, None, None], (n * k, 1, 4))
    sel = jnp.take_along_axis(reg, sel_idx, axis=1)[:, 0, :]
    pred_boxes = apply_deltas(
        proposals.reshape(n * k, 4), sel, ROI_BOX_WEIGHTS
    ).reshape(n, k, 4)
    pred_boxes = post_process(pred_boxes, h, w, out_h, out_w)
    # TODO(synk): per-class NMS in the ROI head is omitted (no clean Pallas equivalent).
    return {
        "pred_boxes": pred_boxes,
        "scores": scores.reshape(n, k),
        "pred_classes": pred_classes.reshape(n, k),
    }


# ------------------------------ parameters ------------------------------------
def init_params(key):
    ks = jax.random.split(key, 6)

    def wgt(k, shape, scale=0.1):
        return (scale * jax.random.normal(k, shape)).astype(jnp.float32)

    return {
        "pixel_mean": jnp.array([123.675, 116.28, 103.53], jnp.float32),
        "pixel_std": jnp.array([58.395, 57.12, 57.375], jnp.float32),
        "bb_w": wgt(ks[0], (9 * C_IN, C_FEAT)),
        "bb_b": jnp.zeros((C_FEAT,), jnp.float32),
        "rpn_w": wgt(ks[1], (C_FEAT, C_FEAT)),
        "rpn_b": jnp.zeros((C_FEAT,), jnp.float32),
        "rpn_head_w": wgt(ks[2], (C_FEAT, 5)),
        "rpn_head_b": jnp.zeros((5,), jnp.float32),
        "box_fc_w": wgt(ks[3], (C_FEAT, C_FEAT)),
        "box_fc_b": jnp.zeros((C_FEAT,), jnp.float32),
        "cls_w": wgt(ks[4], (C_FEAT, NUM_CLASSES + 1)),
        "cls_b": jnp.zeros((NUM_CLASSES + 1,), jnp.float32),
        "reg_w": wgt(ks[5], (C_FEAT, 4 * NUM_CLASSES)),
        "reg_b": jnp.zeros((4 * NUM_CLASSES,), jnp.float32),
    }


# --------------------------------- main ---------------------------------------
if __name__ == "__main__":
    key = jax.random.PRNGKey(0)
    k_img, k_par = jax.random.split(key)
    images = jax.random.uniform(
        k_img, (N_IMG, C_IN, H, W), dtype=jnp.float32, minval=0.0, maxval=255.0
    )
    params = init_params(k_par)

    run = jax.jit(functools.partial(inference, out_h=H, out_w=W))
    out = run(params, images)
    jax.block_until_ready(out)

    assert out["pred_boxes"].shape == (N_IMG, TOPK, 4)
    assert out["scores"].shape == (N_IMG, TOPK)
    assert out["pred_classes"].shape == (N_IMG, TOPK)
    assert bool(jnp.all(jnp.isfinite(out["pred_boxes"])))
    print("KERNEL_OK")
</pallas_src>

<mosaic_0001>
module attributes {stable_mosaic.version = 11 : i64} {
  func.func @_backbone_rpn_kernel(%arg0: i32, %arg1: memref<512x32xf32, #tpu.memory_space<vmem>>, %arg2: memref<32x128xf32, #tpu.memory_space<vmem>>, %arg3: memref<1x128xf32, #tpu.memory_space<vmem>>, %arg4: memref<128x32xf32, #tpu.memory_space<vmem>>, %arg5: memref<1x32xf32, #tpu.memory_space<vmem>>, %arg6: memref<32x128xf32, #tpu.memory_space<vmem>>, %arg7: memref<1x128xf32, #tpu.memory_space<vmem>>, %arg8: memref<512x128xf32, #tpu.memory_space<vmem>>, %arg9: memref<512x128xf32, #tpu.memory_space<vmem>>) attributes {dimension_semantics = [#tpu.dimension_semantics<arbitrary>], iteration_bounds = array<i64: 1>, scalar_prefetch = 0 : i64, scratch_operands = 0 : i64, tpu.core_type = #tpu.core_type<tc>, window_params = [{transform_indices = @transform_0, window_bounds = array<i64: 512, 32>}, {pipeline_mode = #tpu.pipeline_mode<synchronous>, transform_indices = @transform_1, window_bounds = array<i64: 32, 128>}, {pipeline_mode = #tpu.pipeline_mode<synchronous>, transform_indices = @transform_2, window_bounds = array<i64: 1, 128>}, {pipeline_mode = #tpu.pipeline_mode<synchronous>, transform_indices = @transform_3, window_bounds = array<i64: 128, 32>}, {pipeline_mode = #tpu.pipeline_mode<synchronous>, transform_indices = @transform_4, window_bounds = array<i64: 1, 32>}, {pipeline_mode = #tpu.pipeline_mode<synchronous>, transform_indices = @transform_5, window_bounds = array<i64: 32, 128>}, {pipeline_mode = #tpu.pipeline_mode<synchronous>, transform_indices = @transform_6, window_bounds = array<i64: 1, 128>}, {transform_indices = @transform_7, window_bounds = array<i64: 512, 128>}, {transform_indices = @transform_8, window_bounds = array<i64: 512, 128>}]} {
    %c0 = arith.constant 0 : index
    %c0_0 = arith.constant 0 : index
    %0 = vector.load %arg1[%c0, %c0_0] : memref<512x32xf32, #tpu.memory_space<vmem>>, vector<512x32xf32>
    %c0_1 = arith.constant 0 : index
    %c0_2 = arith.constant 0 : index
    %1 = vector.load %arg2[%c0_1, %c0_2] : memref<32x128xf32, #tpu.memory_space<vmem>>, vector<32x128xf32>
    %cst = arith.constant dense<0.000000e+00> : vector<512x128xf32>
    %2 = tpu.matmul %0, %1, %cst {dimension_numbers = #tpu.dot_dimension_numbers<[1], [0], [0], [1], [0, 0, 1, 1], [], []>} : vector<512x32xf32>, vector<32x128xf32>, vector<512x128xf32> -> vector<512x128xf32>
    %c0_3 = arith.constant 0 : index
    %c0_4 = arith.constant 0 : index
    %3 = vector.load %arg3[%c0_3, %c0_4] : memref<1x128xf32, #tpu.memory_space<vmem>>, vector<1x128xf32>
    %4 = vector.broadcast %3 : vector<1x128xf32> to vector<512x128xf32>
    %5 = arith.addf %2, %4 : vector<512x128xf32>
    %cst_5 = arith.constant 0.000000e+00 : f32
    %6 = vector.broadcast %cst_5 : f32 to vector<512x128xf32>
    %7 = arith.maximumf %5, %6 : vector<512x128xf32>
    %c0_6 = arith.constant 0 : index
    %c0_7 = arith.constant 0 : index
    %8 = vector.load %arg8[%c0_6, %c0_7] : memref<512x128xf32, #tpu.memory_space<vmem>>, vector<512x128xf32>
    tpu.vector_store %arg8[%c0_6, %c0_7], %7 {strides = array<i32>} : memref<512x128xf32, #tpu.memory_space<vmem>>, vector<512x128xf32>,
    %c0_8 = arith.constant 0 : index
    %c0_9 = arith.constant 0 : index
    %9 = vector.load %arg4[%c0_8, %c0_9] : memref<128x32xf32, #tpu.memory_space<vmem>>, vector<128x32xf32>
    %cst_10 = arith.constant dense<0.000000e+00> : vector<512x32xf32>
    %10 = tpu.matmul %7, %9, %cst_10 {dimension_numbers = #tpu.dot_dimension_numbers<[1], [0], [0], [1], [0, 0, 1, 1], [], []>} : vector<512x128xf32>, vector<128x32xf32>, vector<512x32xf32> -> vector<512x32xf32>
    %c0_11 = arith.constant 0 : index
    %c0_12 = arith.constant 0 : index
    %11 = vector.load %arg5[%c0_11, %c0_12] : memref<1x32xf32, #tpu.memory_space<vmem>>, vector<1x32xf32>
    %12 = vector.broadcast %11 : vector<1x32xf32> to vector<512x32xf32>
    %13 = arith.addf %10, %12 : vector<512x32xf32>
    %cst_13 = arith.constant 0.000000e+00 : f32
    %14 = vector.broadcast %cst_13 : f32 to vector<512x32xf32>
    %15 = arith.maximumf %13, %14 : vector<512x32xf32>
    %c0_14 = arith.constant 0 : index
    %c0_15 = arith.constant 0 : index
    %16 = vector.load %arg6[%c0_14, %c0_15] : memref<32x128xf32, #tpu.memory_space<vmem>>, vector<32x128xf32>
    %cst_16 = arith.constant dense<0.000000e+00> : vector<512x128xf32>
    %17 = tpu.matmul %15, %16, %cst_16 {dimension_numbers = #tpu.dot_dimension_numbers<[1], [0], [0], [1], [0, 0, 1, 1], [], []>} : vector<512x32xf32>, vector<32x128xf32>, vector<512x128xf32> -> vector<512x128xf32>
    %c0_17 = arith.constant 0 : index
    %c0_18 = arith.constant 0 : index
    %18 = vector.load %arg7[%c0_17, %c0_18] : memref<1x128xf32, #tpu.memory_space<vmem>>, vector<1x128xf32>
    %19 = vector.broadcast %18 : vector<1x128xf32> to vector<512x128xf32>
    %20 = arith.addf %17, %19 : vector<512x128xf32>
    %c0_19 = arith.constant 0 : index
    %c0_20 = arith.constant 0 : index
    %21 = vector.load %arg9[%c0_19, %c0_20] : memref<512x128xf32, #tpu.memory_space<vmem>>, vector<512x128xf32>
    tpu.vector_store %arg9[%c0_19, %c0_20], %20 {strides = array<i32>} : memref<512x128xf32, #tpu.memory_space<vmem>>, vector<512x128xf32>,
    return
  }
  func.func @transform_0(%arg0: i32) -> (i32, i32) {
    %c0_i32 = arith.constant 0 : i32
    %c0_i32_0 = arith.constant 0 : i32
    return %arg0, %c0_i32 : i32, i32
  }
  func.func @transform_1(%arg0: i32) -> (i32, i32) {
    %c0_i32 = arith.constant 0 : i32
    %c0_i32_0 = arith.constant 0 : i32
    %c0_i32_1 = arith.constant 0 : i32
    return %c0_i32, %c0_i32_0 : i32, i32
  }
  func.func @transform_2(%arg0: i32) -> (i32, i32) {
    %c0_i32 = arith.constant 0 : i32
    %c0_i32_0 = arith.constant 0 : i32
    %c0_i32_1 = arith.constant 0 : i32
    return %c0_i32, %c0_i32_0 : i32, i32
  }
  func.func @transform_3(%arg0: i32) -> (i32, i32) {
    %c0_i32 = arith.constant 0 : i32
    %c0_i32_0 = arith.constant 0 : i32
    %c0_i32_1 = arith.constant 0 : i32
    return %c0_i32, %c0_i32_0 : i32, i32
  }
  func.func @transform_4(%arg0: i32) -> (i32, i32) {
    %c0_i32 = arith.constant 0 : i32
    %c0_i32_0 = arith.constant 0 : i32
    %c0_i32_1 = arith.constant 0 : i32
    return %c0_i32, %c0_i32_0 : i32, i32
  }
  func.func @transform_5(%arg0: i32) -> (i32, i32) {
    %c0_i32 = arith.constant 0 : i32
    %c0_i32_0 = arith.constant 0 : i32
    %c0_i32_1 = arith.constant 0 : i32
    return %c0_i32, %c0_i32_0 : i32, i32
  }
  func.func @transform_6(%arg0: i32) -> (i32, i32) {
    %c0_i32 = arith.constant 0 : i32
    %c0_i32_0 = arith.constant 0 : i32
    %c0_i32_1 = arith.constant 0 : i32
    return %c0_i32, %c0_i32_0 : i32, i32
  }
  func.func @transform_7(%arg0: i32) -> (i32, i32) {
    %c0_i32 = arith.constant 0 : i32
    %c0_i32_0 = arith.constant 0 : i32
    return %arg0, %c0_i32 : i32, i32
  }
  func.func @transform_8(%arg0: i32) -> (i32, i32) {
    %c0_i32 = arith.constant 0 : i32
    %c0_i32_0 = arith.constant 0 : i32
    return %arg0, %c0_i32 : i32, i32
  }
}

</mosaic_0001>

<bundles_post_ra>
// kernel: tile.13
= control target key start
LH: loop header
LB: loop body
LE: loop exit
PB: predicated region body
PF: predicated region fallthrough
CT: control target
= control target key end

     0   :  { %s28_s0 = inlined_call_operand.vmem [shape: f32[3], index: 0, kind: input, shape index: {}]   ;;  %s29_s1 = inlined_call_operand.vmem [shape: f32[9,3], index: 1, kind: output, shape index: {}]  }
   0x1   :  { %v4_v0 = vld [vmem:[%s28_s0] ss:$0 sm:$0xff] }
   0x2   :  { %5 = vst [vmem:[%s29_s1] sm:$0xff] %v4_v0  ;;  %8 = vst [vmem:[%s29_s1 + $0x8] sm:$0xff] %v4_v0 }

// kernel: mul.45
= control target key start
LH: loop header
LB: loop body
LE: loop exit
PB: predicated region body
PF: predicated region fallthrough
CT: control target
= control target key end

     0   :  { %s75_s10 = smov 24   ;;  %s76_s11 = smov 18   ;;  %vm3_vm0 = vcmask 23552   ;;  %vm9_vm1 = vcmask 220352   ;;  %vm15_vm2 = vcmask 195752   ;;  %vm21_vm3 = vcmask 171152   ;;  %s123_s0 = inlined_call_operand.vmem [shape: f32[9,3], index: 0, kind: input, shape index: {}]   ;;  %s124_s1 = inlined_call_operand.vmem [shape: f32[27], index: 1, kind: output, shape index: {}]  }
   0x1   :  { %v59_v0 = vld [vmem:[%s123_s0 + $0x8] sm:$0x1]   ;;  %v61_v1 = vld [vmem:[%s123_s0 + $0x6] sm:$0x1]   ;;  %v60_v2 = vld [vmem:[%s123_s0 + $0x7] sm:$0x1]  }
   0x2   :  { %7 = vrot.lane.b32.xlu0 %v59_v0, %s75_s10  ;;  %19 = vrot.lane.b32.xlu1 %v61_v1, %s76_s11  ;;  %v62_v3 = vld [vmem:[%s123_s0 + $0x5] sm:$0x1]   ;;  %v2_v4 = vld [vmem:[%s123_s0] sm:$0x1]   ;;  %s77_s18 = smov 21   ;;  %s78_s19 = smov 15  }
   0x3   :  { %4 = vst.msk [vmem:[#allocation0] sm:$0x1] %vm3_vm0, %v2_v4   ;;  %v63_v5 = vld [vmem:[%s123_s0 + $0x4] sm:$0x1]   ;;  %v64_v6 = vld [vmem:[%s123_s0 + $0x3] sm:$0x1]  }
   0x4   :  { %s79_s24 = smov 12   ;;  %s80_s25 = smov 9   ;;  %v65_v7 = vld [vmem:[%s123_s0 + $0x2] sm:$0x1]   ;;  %v66_v8 = vld [vmem:[%s123_s0 + $0x1] sm:$0x1]  }
   0x5   :  { %s81_s0 = smov 6   ;;  %s82_s30 = smov 3   ;;  %vm27_vm4 = vcmask 146552   ;;  %vm33_vm5 = vcmask 121952   ;;  %vm39_vm6 = vcmask 97352   ;;  %vm45_vm7 = vcmask 72752  }
   0x6   :  { %13 = vrot.lane.b32.xlu0 %v60_v2, %s77_s18  ;;  %25 = vrot.lane.b32.xlu1 %v62_v3, %s78_s19  ;;  %vm51_vm8 = vcmask 48152  }
   0xa   :  { %31 = vrot.lane.b32.xlu0 %v63_v5, %s79_s24  ;;  %37 = vrot.lane.b32.xlu1 %v64_v6, %s80_s25 }
   0xe   :  { %43 = vrot.lane.b32.xlu0 %v65_v7, %s81_s0  ;;  %49 = vrot.lane.b32.xlu1 %v66_v8, %s82_s30 }
  0x74   :  { %v8_v9 = vpop.permute.xlu0 %7   ;;  %v20_v10 = vpop.permute.xlu1 %19  }
  0x75   :  { %10 = vst.msk [vmem:[#allocation0] sm:$0x1] %vm9_vm1, %v8_v9  }
  0x78   :  { %v14_v11 = vpop.permute.xlu0 %13   ;;  %v26_v12 = vpop.permute.xlu1 %25  }
  0x79   :  { %16 = vst.msk [vmem:[#allocation0] sm:$0x1] %vm15_vm2, %v14_v11  }
  0x7a   :  { %22 = vst.msk [vmem:[#allocation0] sm:$0x1] %vm21_vm3, %v20_v10  }
  0x7b   :  { %28 = vst.msk [vmem:[#allocation0] sm:$0x1] %vm27_vm4, %v26_v12  }
  0x7c   :  { %v32_v13 = vpop.permute.xlu0 %31   ;;  %v38_v14 = vpop.permute.xlu1 %37  }
  0x7d   :  { %34 = vst.msk [vmem:[#allocation0] sm:$0x1] %vm33_vm5, %v32_v13  }
  0x7e   :  { %40 = vst.msk [vmem:[#allocation0] sm:$0x1] %vm39_vm6, %v38_v14  }
  0x80   :  { %v44_v15 = vpop.permute.xlu0 %43   ;;  %v50_v16 = vpop.permute.xlu1 %49  }
  0x81   :  { %46 = vst.msk [vmem:[#allocation0] sm:$0x1] %vm45_vm7, %v44_v15  }
  0x82   :  { %52 = vst.msk [vmem:[#allocation0] sm:$0x1] %vm51_vm8, %v50_v16  }
  0x89   :  { %v56_v17 = vld [vmem:[#allocation0] sm:$0x1] }
  0x8a   :  { %58 = vst [vmem:[%s124_s1] sm:$0x1] %v56_v17 }

// kernel: sub.15
= control target key start
LH: loop header
LB: loop body
LE: loop exit
PB: predicated region body
PF: predicated region fallthrough
CT: control target
= control target key end

     0   :  { %s34_s0 = inlined_call_operand.vmem [shape: f32[32], index: 0, kind: input, shape index: {}]   ;;  %s35_s1 = inlined_call_operand.vmem [shape: f32[32], index: 1, kind: input, shape index: {}]   ;;  %s36_s2 = inlined_call_operand.vmem [shape: f32[32], index: 2, kind: output, shape index: {}]  }
   0x1   :  { %v3_v0 = vld [vmem:[%s34_s0] sm:$0x1] }
   0x2   :  { %v4_v1 = vld [vmem:[%s35_s1] sm:$0x1] }
   0x3   :  { %v7_v2 = vsub.f32 %v3_v0, %v4_v1 }
   0x5   :  { %9 = vst [vmem:[%s36_s2] sm:$0x1] %v7_v2 }

// kernel: inference.1
= control target key start
LH: loop header
LB: loop body
LE: loop exit
PB: predicated region body
PF: predicated region fallthrough
CT: control target
= control target key end

     0   :  { %vm103_vm0 = vcmask 261120   ;;  %s3896_s1 = inlined_call_operand.vmem [shape: f32[32,128], index: 1, kind: input, shape index: {}]   ;;  %s3897_s0 = inlined_call_operand.vmem [shape: f32[512,32], index: 0, kind: input, shape index: {}]   ;;  %s3898_s3 = inlined_call_operand.vmem [shape: f32[128,32], index: 3, kind: input, shape index: {}]   ;;  %s3899_s2 = inlined_call_operand.vmem [shape: f32[1,128], index: 2, kind: input, shape index: {}]   ;;  %s3900_s7 = inlined_call_operand.vmem [shape: f32[512,128], index: 7, kind: output, shape index: {0}]   ;;  %s3901_s5 = inlined_call_operand.vmem [shape: f32[32,128], index: 5, kind: input, shape index: {}]   ;;  %s3902_s4 = inlined_call_operand.vmem [shape: f32[1,32], index: 4, kind: input, shape index: {}]   ;;  %s3903_s6 = inlined_call_operand.vmem [shape: f32[1,128], index: 6, kind: input, shape index: {}]   ;;  %s3904_s8 = inlined_call_operand.vmem [shape: f32[512,128], index: 8, kind: output, shape index: {1}]  }
   0x1   :  { %v92_v0 = vld [vmem:[%s3896_s1] sm:$0xff]  ;;  %v93_v1 = vld [vmem:[%s3896_s1 + $0x8] sm:$0xff]  ;;  %v94_v2 = vld [vmem:[%s3896_s1 + $0x10] sm:$0xff] }
   0x2   :  { %v2624_v3 = vpack.c.bf16 %v93_v1, %v92_v0  ;;  %v95_v4 = vld [vmem:[%s3896_s1 + $0x18] sm:$0xff]  ;;  %v28_v5 = vld [vmem:[%s3897_s0] sm:$0xff]  ;;  %v29_v7 = vld [vmem:[%s3897_s0 + $0x8] sm:$0xff] }
   0x3   :  { %v2628_v6 = vpack.c.bf16 %v95_v4, %v94_v2  ;;  %2296 = vmatprep.mubr.msk.f32.mxu0 %vm103_vm0, %v28_v5  ;;  %v30_v8 = vld [vmem:[%s3897_s0 + $0x10] sm:$0xff]  ;;  %v31_v9 = vld [vmem:[%s3897_s0 + $0x18] sm:$0xff]  ;;  %v60_v10 = vld [vmem:[%s3897_s0 + $0x100] sm:$0xff] }
   0x4   :  { %2625 = vmatprep.subr.bf16.mxu0 %v2624_v3  ;;  %2672 = vmatprep.subr.bf16.mxu1 %v2624_v3  ;;  %v61_v11 = vld [vmem:[%s3897_s0 + $0x108] sm:$0xff]  ;;  %v62_v12 = vld [vmem:[%s3897_s0 + $0x110] sm:$0xff]  ;;  %v32_v13 = vld [vmem:[%s3897_s0 + $0x20] sm:$0xff] }
   0x5   :  { %2627 = vmatpush3.bf16.msra.mxu0 %v2624_v3  ;;  %2674 = vmatpush3.bf16.msra.mxu1 %v2624_v3  ;;  %v63_v14 = vld [vmem:[%s3897_s0 + $0x118] sm:$0xff]  ;;  %v33_v15 = vld [vmem:[%s3897_s0 + $0x28] sm:$0xff]  ;;  %v64_v16 = vld [vmem:[%s3897_s0 + $0x120] sm:$0xff] }
   0x6   :  { %2629 = vmatprep.subr.bf16.mxu0 %v2628_v6  ;;  %2673 = vmatprep.subr.bf16.mxu1 %v2628_v6  ;;  %v34_v17 = vld [vmem:[%s3897_s0 + $0x30] sm:$0xff]  ;;  %v65_v18 = vld [vmem:[%s3897_s0 + $0x128] sm:$0xff]  ;;  %v35_v19 = vld [vmem:[%s3897_s0 + $0x38] sm:$0xff] }
   0x7   :  { %2344 = vmatprep.mubr.msk.f32.mxu1 %vm103_vm0, %v60_v10  ;;  %v66_v20 = vld [vmem:[%s3897_s0 + $0x130] sm:$0xff]  ;;  %v36_v21 = vld [vmem:[%s3897_s0 + $0x40] sm:$0xff]  ;;  %v67_v22 = vld [vmem:[%s3897_s0 + $0x138] sm:$0xff] }
   0x8   :  { %v809_v23 = vld [vmem:[%s3898_s3] sm:$0xff]  ;;  %v810_v24 = vld [vmem:[%s3898_s3 + $0x8] sm:$0xff]  ;;  %v811_v25 = vld [vmem:[%s3898_s3 + $0x10] sm:$0xff] }
   0x9   :  { %2631 = vmatpush3.bf16.msra.mxu0 %v2628_v6  ;;  %2675 = vmatpush3.bf16.msra.mxu1 %v2628_v6  ;;  %v812_v26 = vld [vmem:[%s3898_s3 + $0x18] sm:$0xff]  ;;  %v37_v27 = vld [vmem:[%s3897_s0 + $0x48] sm:$0xff]  ;;  %v68_v28 = vld [vmem:[%s3897_s0 + $0x140] sm:$0xff]  ;;  %v2632_v29 = vpack.c.bf16 %v810_v24, %v809_v23 }
   0xa   :  { %v38_v30 = vld [vmem:[%s3897_s0 + $0x50] sm:$0xff]  ;;  %v2636_v31 = vpack.c.bf16 %v812_v26, %v811_v25  ;;  %v813_v32 = vld [vmem:[%s3898_s3 + $0x20] sm:$0xff]  ;;  %v814_v33 = vld [vmem:[%s3898_s3 + $0x28] sm:$0xff] }
   0xb   :  { %2633 = vmatprep.subr.bf16.mxu1 %v2632_v29  ;;  %v69_v34 = vld [vmem:[%s3897_s0 + $0x148] sm:$0xff]  ;;  %v39_v35 = vld [vmem:[%s3897_s0 + $0x58] sm:$0xff]  ;;  %v70_v36 = vld [vmem:[%s3897_s0 + $0x150] sm:$0xff]  ;;  %v2640_v38 = vpack.c.bf16 %v814_v33, %v813_v32 }
   0xc   :  { %2297 = vmatmul.mubr.msk.f32.vlgmr.msra.gmra.mrb[0].mxu0 %vm103_vm0, %v29_v7  ;;  %2345 = vmatmul.mubr.msk.f32.vlgmr.msra.gmra.mrb[0].mxu1 %vm103_vm0, %v61_v11  ;;  %v40_v37 = vld [vmem:[%s3897_s0 + $0x60] sm:$0xff]  ;;  %v815_v39 = vld [vmem:[%s3898_s3 + $0x30] sm:$0xff]  ;;  %v816_v40 = vld [vmem:[%s3898_s3 + $0x38] sm:$0xff] }
   0xd   :  { %2299 = vmatprep.mubr.msk.f32.mxu0 %vm103_vm0, %v30_v8  ;;  %2347 = vmatprep.mubr.msk.f32.mxu1 %vm103_vm0, %v62_v12  ;;  %v71_v41 = vld [vmem:[%s3897_s0 + $0x158] sm:$0xff]  ;;  %v41_v42 = vld [vmem:[%s3897_s0 + $0x68] sm:$0xff]  ;;  %v72_v43 = vld [vmem:[%s3897_s0 + $0x160] sm:$0xff]  ;;  %v2644_v45 = vpack.c.bf16 %v816_v40, %v815_v39 }
   0xe   :  { %2635 = vmatpush3.bf16.msra.mxu1 %v2632_v29  ;;  %v42_v44 = vld [vmem:[%s3897_s0 + $0x70] sm:$0xff]  ;;  %v817_v46 = vld [vmem:[%s3898_s3 + $0x40] sm:$0xff]  ;;  %v818_v47 = vld [vmem:[%s3898_s3 + $0x48] sm:$0xff] }
   0xf   :  { %2637 = vmatprep.subr.bf16.mxu1 %v2636_v31  ;;  %v73_v48 = vld [vmem:[%s3897_s0 + $0x168] sm:$0xff]  ;;  %v43_v49 = vld [vmem:[%s3897_s0 + $0x78] sm:$0xff]  ;;  %v74_v50 = vld [vmem:[%s3897_s0 + $0x170] sm:$0xff]  ;;  %v2648_v52 = vpack.c.bf16 %v818_v47, %v817_v46 }
  0x10   :  { %2300 = vmatmul.mubr.msk.f32.gmra.mrb[2].mxu0 %vm103_vm0, %v31_v9  ;;  %2348 = vmatmul.mubr.msk.f32.gmra.mrb[2].mxu1 %vm103_vm0, %v63_v14  ;;  %v44_v51 = vld [vmem:[%s3897_s0 + $0x80] sm:$0xff]  ;;  %v819_v53 = vld [vmem:[%s3898_s3 + $0x50] sm:$0xff]  ;;  %v820_v54 = vld [vmem:[%s3898_s3 + $0x58] sm:$0xff] }
  0x11   :  { %2302 = vmatprep.mubr.msk.f32.mxu0 %vm103_vm0, %v32_v13  ;;  %2350 = vmatprep.mubr.msk.f32.mxu1 %vm103_vm0, %v64_v16  ;;  %v75_v55 = vld [vmem:[%s3897_s0 + $0x178] sm:$0xff]  ;;  %v45_v56 = vld [vmem:[%s3897_s0 + $0x88] sm:$0xff]  ;;  %v76_v57 = vld [vmem:[%s3897_s0 + $0x180] sm:$0xff]  ;;  %v2652_v59 = vpack.c.bf16 %v820_v54, %v819_v53 }
  0x12   :  { %2639 = vmatpush3.bf16.msra.mxu1 %v2636_v31  ;;  %v46_v58 = vld [vmem:[%s3897_s0 + $0x90] sm:$0xff]  ;;  %v821_v60 = vld [vmem:[%s3898_s3 + $0x60] sm:$0xff]  ;;  %v822_v61 = vld [vmem:[%s3898_s3 + $0x68] sm:$0xff] }
  0x13   :  { %2641 = vmatprep.subr.bf16.mxu1 %v2640_v38  ;;  %v77_v62 = vld [vmem:[%s3897_s0 + $0x188] sm:$0xff]  ;;  %v47_v63 = vld [vmem:[%s3897_s0 + $0x98] sm:$0xff]  ;;  %v78_v0 = vld [vmem:[%s3897_s0 + $0x190] sm:$0xff]  ;;  %v2656_v2 = vpack.c.bf16 %v822_v61, %v821_v60 }
  0x14   :  { %2303 = vmatmul.mubr.msk.f32.gmra.mrb[4].mxu0 %vm103_vm0, %v33_v15  ;;  %2351 = vmatmul.mubr.msk.f32.gmra.mrb[4].mxu1 %vm103_vm0, %v65_v18  ;;  %v48_v1 = vld [vmem:[%s3897_s0 + $0xa0] sm:$0xff]  ;;  %v823_v3 = vld [vmem:[%s3898_s3 + $0x70] sm:$0xff]  ;;  %v824_v4 = vld [vmem:[%s3898_s3 + $0x78] sm:$0xff] }
  0x15   :  { %2305 = vmatprep.mubr.msk.f32.mxu0 %vm103_vm0, %v34_v17  ;;  %2353 = vmatprep.mubr.msk.f32.mxu1 %vm103_vm0, %v66_v20  ;;  %v79_v5 = vld [vmem:[%s3897_s0 + $0x198] sm:$0xff]  ;;  %v49_v6 = vld [vmem:[%s3897_s0 + $0xa8] sm:$0xff]  ;;  %v80_v7 = vld [vmem:[%s3897_s0 + $0x1a0] sm:$0xff]  ;;  %v2660_v9 = vpack.c.bf16 %v824_v4, %v823_v3 }
  0x16   :  { %2643 = vmatpush3.bf16.msra.mxu1 %v2640_v38  ;;  %v50_v8 = vld [vmem:[%s3897_s0 + $0xb0] sm:$0xff]  ;;  %v81_v10 = vld [vmem:[%s3897_s0 + $0x1a8] sm:$0xff]  ;;  %v51_v11 = vld [vmem:[%s3897_s0 + $0xb8] sm:$0xff] }
  0x17   :  { %2645 = vmatprep.subr.bf16.mxu1 %v2644_v45  ;;  %v82_v12 = vld [vmem:[%s3897_s0 + $0x1b0] sm:$0xff]  ;;  %v52_v13 = vld [vmem:[%s3897_s0 + $0xc0] sm:$0xff]  ;;  %v83_v14 = vld [vmem:[%s3897_s0 + $0x1b8] sm:$0xff] }
  0x18   :  { %2306 = vmatmul.mubr.msk.f32.gmra.mrb[6].mxu0 %vm103_vm0, %v35_v19  ;;  %2354 = vmatmul.mubr.msk.f32.gmra.mrb[6].mxu1 %vm103_vm0, %v67_v22  ;;  %v53_v15 = vld [vmem:[%s3897_s0 + $0xc8] sm:$0xff]  ;;  %v84_v16 = vld [vmem:[%s3897_s0 + $0x1c0] sm:$0xff]  ;;  %v54_v17 = vld [vmem:[%s3897_s0 + $0xd0] sm:$0xff] }
  0x19   :  { %2308 = vmatprep.mubr.msk.f32.mxu0 %vm103_vm0, %v36_v21  ;;  %2356 = vmatprep.mubr.msk.f32.mxu1 %vm103_vm0, %v68_v28  ;;  %v85_v18 = vld [vmem:[%s3897_s0 + $0x1c8] sm:$0xff]  ;;  %v55_v19 = vld [vmem:[%s3897_s0 + $0xd8] sm:$0xff]  ;;  %v86_v20 = vld [vmem:[%s3897_s0 + $0x1d0] sm:$0xff] }
  0x1a   :  { %2647 = vmatpush3.bf16.msra.mxu1 %v2644_v45  ;;  %v56_v21 = vld [vmem:[%s3897_s0 + $0xe0] sm:$0xff]  ;;  %v87_v22 = vld [vmem:[%s3897_s0 + $0x1d8] sm:$0xff]  ;;  %v57_v23 = vld [vmem:[%s3897_s0 + $0xe8] sm:$0xff] }
  0x1b   :  { %2649 = vmatprep.subr.bf16.mxu1 %v2648_v52  ;;  %v88_v24 = vld [vmem:[%s3897_s0 + $0x1e0] sm:$0xff]  ;;  %v58_v25 = vld [vmem:[%s3897_s0 + $0xf0] sm:$0xff]  ;;  %v89_v26 = vld [vmem:[%s3897_s0 + $0x1e8] sm:$0xff] }
  0x1c   :  { %2309 = vmatmul.mubr.msk.f32.gmra.mrb[8].mxu0 %vm103_vm0, %v37_v27  ;;  %2357 = vmatmul.mubr.msk.f32.gmra.mrb[8].mxu1 %vm103_vm0, %v69_v34  ;;  %v59_v27 = vld [vmem:[%s3897_s0 + $0xf8] sm:$0xff]  ;;  %v90_v28 = vld [vmem:[%s3897_s0 + $0x1f0] sm:$0xff] }
  0x1d   :  { %2311 = vmatprep.mubr.msk.f32.mxu0 %vm103_vm0, %v38_v30  ;;  %2359 = vmatprep.mubr.msk.f32.mxu1 %vm103_vm0, %v70_v36  ;;  %v91_v29 = vld [vmem:[%s3897_s0 + $0x1f8] sm:$0xff]  ;;  %v3040_v30 = vld [vmem:[%s3899_s2] ss:$0 sm:$0xff] }
  0x1e   :  { %2651 = vmatpush3.bf16.msra.mxu1 %v2648_v52 }
  0x1f   :  { %2653 = vmatprep.subr.bf16.mxu1 %v2652_v59 }
  0x20   :  { %2312 = vmatmul.mubr.msk.f32.gmra.mrb[10].mxu0 %vm103_vm0, %v39_v35  ;;  %2360 = vmatmul.mubr.msk.f32.gmra.mrb[10].mxu1 %vm103_vm0, %v71_v41  ;;  %v1281_v41 = vld [vmem:[%s3901_s5] sm:$0xff] }
  0x21   :  { %2314 = vmatprep.mubr.msk.f32.mxu0 %vm103_vm0, %v40_v37  ;;  %2362 = vmatprep.mubr.msk.f32.mxu1 %vm103_vm0, %v72_v43  ;;  %v1283_v43 = vld [vmem:[%s3901_s5 + $0x10] sm:$0xff] }
  0x22   :  { %2655 = vmatpush3.bf16.msra.mxu1 %v2652_v59 }
  0x23   :  { %2657 = vmatprep.subr.bf16.mxu1 %v2656_v2 }
  0x24   :  { %2315 = vmatmul.mubr.msk.f32.gmra.mrb[12].mxu0 %vm103_vm0, %v41_v42  ;;  %2363 = vmatmul.mubr.msk.f32.gmra.mrb[12].mxu1 %vm103_vm0, %v73_v48  ;;  %v1282_v42 = vld [vmem:[%s3901_s5 + $0x8] sm:$0xff]  ;;  %v1284_v48 = vld [vmem:[%s3901_s5 + $0x18] sm:$0xff] }
  0x25   :  { %2317 = vmatprep.mubr.msk.f32.mxu0 %vm103_vm0, %v42_v44  ;;  %2365 = vmatprep.mubr.msk.f32.mxu1 %vm103_vm0, %v74_v50  ;;  %v2664_v47 = vpack.c.bf16 %v1282_v42, %v1281_v41 }
  0x26   :  { %2659 = vmatpush3.bf16.msra.mxu1 %v2656_v2 }
  0x27   :  { %2661 = vmatprep.subr.bf16.mxu1 %v2660_v9  ;;  %2665 = vmatprep.subr.bf16.mxu0 %v2664_v47 }
  0x28   :  { %2318 = vmatmul.mubr.msk.f32.gmra.mrb[14].mxu0 %vm103_vm0, %v43_v49  ;;  %2366 = vmatmul.mubr.msk.f32.gmra.mrb[14].mxu1 %vm103_vm0, %v75_v55 }
  0x29   :  { %2320 = vmatprep.mubr.msk.f32.mxu0 %vm103_vm0, %v44_v51  ;;  %2368 = vmatprep.mubr.msk.f32.mxu1 %vm103_vm0, %v76_v57  ;;  %v2668_v51 = vpack.c.bf16 %v1284_v48, %v1283_v43 }
  0x2a   :  { %2663 = vmatpush3.bf16.msra.mxu1 %v2660_v9  ;;  %2667 = vmatpush3.bf16.msra.mxu0 %v2664_v47 }
  0x2b   :  { %2669 = vmatprep.subr.bf16.mxu0 %v2668_v51 }
  0x2c   :  { %2321 = vmatmul.mubr.msk.f32.gmra.mrb[16].mxu0 %vm103_vm0, %v45_v56  ;;  %2369 = vmatmul.mubr.msk.f32.gmra.mrb[16].mxu1 %vm103_vm0, %v77_v62 }
  0x2d   :  { %2323 = vmatprep.mubr.msk.f32.mxu0 %vm103_vm0, %v46_v58  ;;  %2371 = vmatprep.mubr.msk.f32.mxu1 %vm103_vm0, %v78_v0 }
  0x2e   :  { %2671 = vmatpush3.bf16.msra.mxu0 %v2668_v51 }
  0x30   :  { %2324 = vmatmul.mubr.msk.f32.gmra.mrb[18].mxu0 %vm103_vm0, %v47_v63  ;;  %2372 = vmatmul.mubr.msk.f32.gmra.mrb[18].mxu1 %vm103_vm0, %v79_v5 }
  0x31   :  { %2326 = vmatprep.mubr.msk.f32.mxu0 %vm103_vm0, %v48_v1  ;;  %2374 = vmatprep.mubr.msk.f32.mxu1 %vm103_vm0, %v80_v7 }
  0x34   :  { %2327 = vmatmul.mubr.msk.f32.gmra.mrb[20].mxu0 %vm103_vm0, %v49_v6  ;;  %2375 = vmatmul.mubr.msk.f32.gmra.mrb[20].mxu1 %vm103_vm0, %v81_v10 }
  0x35   :  { %2329 = vmatprep.mubr.msk.f32.mxu0 %vm103_vm0, %v50_v8  ;;  %2377 = vmatprep.mubr.msk.f32.mxu1 %vm103_vm0, %v82_v12 }
  0x38   :  { %2330 = vmatmul.mubr.msk.f32.gmra.mrb[22].mxu0 %vm103_vm0, %v51_v11  ;;  %2378 = vmatmul.mubr.msk.f32.gmra.mrb[22].mxu1 %vm103_vm0, %v83_v14 }
  0x39   :  { %2332 = vmatprep.mubr.msk.f32.mxu0 %vm103_vm0, %v52_v13  ;;  %2380 = vmatprep.mubr.msk.f32.mxu1 %vm103_vm0, %v84_v16 }
  0x3c   :  { %2333 = vmatmul.mubr.msk.f32.gmra.mrb[24].mxu0 %vm103_vm0, %v53_v15  ;;  %2381 = vmatmul.mubr.msk.f32.gmra.mrb[24].mxu1 %vm103_vm0, %v85_v18 }
  0x3d   :  { %2335 = vmatprep.mubr.msk.f32.mxu0 %vm103_vm0, %v54_v17  ;;  %2383 = vmatprep.mubr.msk.f32.mxu1 %vm103_vm0, %v86_v20 }
  0x40   :  { %2336 = vmatmul.mubr.msk.f32.gmra.mrb[26].mxu0 %vm103_vm0, %v55_v19  ;;  %2384 = vmatmul.mubr.msk.f32.gmra.mrb[26].mxu1 %vm103_vm0, %v87_v22 }
  0x41   :  { %2338 = vmatprep.mubr.msk.f32.mxu0 %vm103_vm0, %v56_v21  ;;  %2386 = vmatprep.mubr.msk.f32.mxu1 %vm103_vm0, %v88_v24 }
  0x44   :  { %2339 = vmatmul.mubr.msk.f32.gmra.mrb[28].mxu0 %vm103_vm0, %v57_v23  ;;  %2387 = vmatmul.mubr.msk.f32.gmra.mrb[28].mxu1 %vm103_vm0, %v89_v26 }
  0x45   :  { %2341 = vmatprep.mubr.msk.f32.mxu0 %vm103_vm0, %v58_v25  ;;  %2389 = vmatprep.mubr.msk.f32.mxu1 %vm103_vm0, %v90_v28 }
  0x48   :  { %2342 = vmatmul.mubr.msk.f32.gmra.mrb[30].mxu0 %vm103_vm0, %v59_v27  ;;  %2390 = vmatmul.mubr.msk.f32.gmra.mrb[30].mxu1 %vm103_vm0, %v91_v29 }
  0xdf   :  { %v2298_v31 = vpop.f32.mrb[0].mxu0  ;;  %v2346_v36 = vpop.f32.mrb[0].mxu1 }
  0xe0   :  { %v368_v32 = vadd.f32 %v2298_v31, %v3040_v30  ;;  %v362_v33 = vpop.f32.mrb[1].mxu0  ;;  %v3045_v39 = vadd.f32 %v2346_v36, %v3040_v30  ;;  %v522_v40 = vpop.f32.mrb[1].mxu1 }
  0xe1   :  { %v363_v34 = vadd.f32 %v3040_v30, %v362_v33  ;;  %v3061_v46 = vadd.f32 %v3040_v30, %v522_v40 }
  0xe2   :  { %v682_v35 = vmax.f32 %v368_v32, 0.0  ;;  %v714_v50 = vmax.f32 %v3045_v39, 0.0 }
  0xe3   :  { %v681_v37 = vmax.f32 %v363_v34, 0.0  ;;  %v2301_v38 = vpop.f32.mrb[2].mxu0  ;;  %v713_v53 = vmax.f32 %v3061_v46, 0.0  ;;  %v2349_v54 = vpop.f32.mrb[2].mxu1 }
  0xe4   :  { %746 = vst [vmem:[%s3900_s7 + $0x8] sm:$0xff] %v682_v35  ;;  %v378_v44 = vadd.f32 %v2301_v38, %v3040_v30  ;;  %v372_v45 = vpop.f32.mrb[3].mxu0  ;;  %778 = vst [vmem:[%s3900_s7 + $0x108] sm:$0xff] %v714_v50  ;;  %v3078_v57 = vadd.f32 %v2349_v54, %v3040_v30  ;;  %v532_v58 = vpop.f32.mrb[3].mxu1 }
  0xe5   :  { %745 = vst [vmem:[%s3900_s7] sm:$0xff] %v681_v37  ;;  %v373_v49 = vadd.f32 %v3040_v30, %v372_v45  ;;  %2424 = vmatprep.mubr.f32.mxu1 %v681_v37  ;;  %777 = vst [vmem:[%s3900_s7 + $0x100] sm:$0xff] %v713_v53  ;;  %v3090_v61 = vadd.f32 %v3040_v30, %v532_v58 }
  0xe6   :  { %v684_v52 = vmax.f32 %v378_v44, 0.0  ;;  %2425 = vmatmul.mubr.f32.vlgmr.msra.gmra.mrb[32].mxu1 %v682_v35  ;;  %v716_v63 = vmax.f32 %v3078_v57, 0.0 }
  0xe7   :  { %v683_v55 = vmax.f32 %v373_v49, 0.0  ;;  %v2304_v56 = vpop.f32.mrb[4].mxu0  ;;  %v715_v1 = vmax.f32 %v3090_v61, 0.0  ;;  %v2352_v2 = vpop.f32.mrb[4].mxu1  ;;  %v3505_v61 = vld [vmem:[%s3902_s4] ss:$0 sm:$0xff] }
  0xe8   :  { %748 = vst [vmem:[%s3900_s7 + $0x18] sm:$0xff] %v684_v52  ;;  %v388_v59 = vadd.f32 %v2304_v56, %v3040_v30  ;;  %v382_v60 = vpop.f32.mrb[5].mxu0  ;;  %780 = vst [vmem:[%s3900_s7 + $0x118] sm:$0xff] %v716_v63  ;;  %v3104_v5 = vadd.f32 %v2352_v2, %v3040_v30  ;;  %v542_v6 = vpop.f32.mrb[5].mxu1 }
  0xe9   :  { %747 = vst [vmem:[%s3900_s7 + $0x10] sm:$0xff] %v683_v55  ;;  %v383_v62 = vadd.f32 %v3040_v30, %v382_v60  ;;  %2427 = vmatprep.mubr.f32.mxu1 %v683_v55  ;;  %779 = vst [vmem:[%s3900_s7 + $0x110] sm:$0xff] %v715_v1  ;;  %v3116_v9 = vadd.f32 %v3040_v30, %v542_v6 }
  0xea   :  { %v686_v0 = vmax.f32 %v388_v59, 0.0  ;;  %2428 = vmatmul.mubr.f32.gmra.mrb[34].mxu1 %v684_v52  ;;  %v718_v11 = vmax.f32 %v3104_v5, 0.0 }
  0xeb   :  { %v685_v3 = vmax.f32 %v383_v62, 0.0  ;;  %v2307_v4 = vpop.f32.mrb[6].mxu0  ;;  %v717_v13 = vmax.f32 %v3116_v9, 0.0  ;;  %v2355_v14 = vpop.f32.mrb[6].mxu1 }
  0xec   :  { %750 = vst [vmem:[%s3900_s7 + $0x28] sm:$0xff] %v686_v0  ;;  %v398_v7 = vadd.f32 %v2307_v4, %v3040_v30  ;;  %v392_v8 = vpop.f32.mrb[7].mxu0  ;;  %782 = vst [vmem:[%s3900_s7 + $0x128] sm:$0xff] %v718_v11  ;;  %v3130_v17 = vadd.f32 %v2355_v14, %v3040_v30  ;;  %v552_v18 = vpop.f32.mrb[7].mxu1 }
  0xed   :  { %749 = vst [vmem:[%s3900_s7 + $0x20] sm:$0xff] %v685_v3  ;;  %v393_v10 = vadd.f32 %v3040_v30, %v392_v8  ;;  %2430 = vmatprep.mubr.f32.mxu1 %v685_v3  ;;  %781 = vst [vmem:[%s3900_s7 + $0x120] sm:$0xff] %v717_v13  ;;  %v3142_v21 = vadd.f32 %v3040_v30, %v552_v18 }
  0xee   :  { %v688_v12 = vmax.f32 %v398_v7, 0.0  ;;  %2431 = vmatmul.mubr.f32.gmra.mrb[36].mxu1 %v686_v0  ;;  %v720_v23 = vmax.f32 %v3130_v17, 0.0 }
  0xef   :  { %v687_v15 = vmax.f32 %v393_v10, 0.0  ;;  %v2310_v16 = vpop.f32.mrb[8].mxu0  ;;  %v719_v25 = vmax.f32 %v3142_v21, 0.0  ;;  %v2358_v26 = vpop.f32.mrb[8].mxu1 }
  0xf0   :  { %752 = vst [vmem:[%s3900_s7 + $0x38] sm:$0xff] %v688_v12  ;;  %v408_v19 = vadd.f32 %v2310_v16, %v3040_v30  ;;  %v402_v20 = vpop.f32.mrb[9].mxu0  ;;  %784 = vst [vmem:[%s3900_s7 + $0x138] sm:$0xff] %v720_v23  ;;  %v3156_v29 = vadd.f32 %v2358_v26, %v3040_v30  ;;  %v562_v31 = vpop.f32.mrb[9].mxu1 }
  0xf1   :  { %751 = vst [vmem:[%s3900_s7 + $0x30] sm:$0xff] %v687_v15  ;;  %v403_v22 = vadd.f32 %v3040_v30, %v402_v20  ;;  %2433 = vmatprep.mubr.f32.mxu1 %v687_v15  ;;  %783 = vst [vmem:[%s3900_s7 + $0x130] sm:$0xff] %v719_v25  ;;  %v3168_v34 = vadd.f32 %v3040_v30, %v562_v31 }
  0xf2   :  { %v690_v24 = vmax.f32 %v408_v19, 0.0  ;;  %2434 = vmatmul.mubr.f32.gmra.mrb[38].mxu1 %v688_v12  ;;  %v722_v36 = vmax.f32 %v3156_v29, 0.0 }
  0xf3   :  { %v689_v27 = vmax.f32 %v403_v22, 0.0  ;;  %v2313_v28 = vpop.f32.mrb[10].mxu0  ;;  %v721_v38 = vmax.f32 %v3168_v34, 0.0  ;;  %v2361_v40 = vpop.f32.mrb[10].mxu1 }
  0xf4   :  { %754 = vst [vmem:[%s3900_s7 + $0x48] sm:$0xff] %v690_v24  ;;  %v418_v32 = vadd.f32 %v2313_v28, %v3040_v30  ;;  %v412_v33 = vpop.f32.mrb[11].mxu0  ;;  %786 = vst [vmem:[%s3900_s7 + $0x148] sm:$0xff] %v722_v36  ;;  %v3182_v43 = vadd.f32 %v2361_v40, %v3040_v30  ;;  %v572_v44 = vpop.f32.mrb[11].mxu1 }
  0xf5   :  { %753 = vst [vmem:[%s3900_s7 + $0x40] sm:$0xff] %v689_v27  ;;  %v413_v35 = vadd.f32 %v3040_v30, %v412_v33  ;;  %2436 = vmatprep.mubr.f32.mxu1 %v689_v27  ;;  %785 = vst [vmem:[%s3900_s7 + $0x140] sm:$0xff] %v721_v38  ;;  %v3194_v48 = vadd.f32 %v3040_v30, %v572_v44 }
  0xf6   :  { %v692_v37 = vmax.f32 %v418_v32, 0.0  ;;  %2437 = vmatmul.mubr.f32.gmra.mrb[40].mxu1 %v690_v24  ;;  %v724_v51 = vmax.f32 %v3182_v43, 0.0 }
  0xf7   :  { %v691_v41 = vmax.f32 %v413_v35, 0.0  ;;  %v2316_v42 = vpop.f32.mrb[12].mxu0  ;;  %v723_v54 = vmax.f32 %v3194_v48, 0.0  ;;  %v2364_v55 = vpop.f32.mrb[12].mxu1 }
  0xf8   :  { %756 = vst [vmem:[%s3900_s7 + $0x58] sm:$0xff] %v692_v37  ;;  %v428_v45 = vadd.f32 %v2316_v42, %v3040_v30  ;;  %v422_v47 = vpop.f32.mrb[13].mxu0  ;;  %788 = vst [vmem:[%s3900_s7 + $0x158] sm:$0xff] %v724_v51  ;;  %v3208_v59 = vadd.f32 %v2364_v55, %v3040_v30  ;;  %v582_v60 = vpop.f32.mrb[13].mxu1 }
  0xf9   :  { %755 = vst [vmem:[%s3900_s7 + $0x50] sm:$0xff] %v691_v41  ;;  %v423_v49 = vadd.f32 %v3040_v30, %v422_v47  ;;  %2439 = vmatprep.mubr.f32.mxu1 %v691_v41  ;;  %787 = vst [vmem:[%s3900_s7 + $0x150] sm:$0xff] %v723_v54  ;;  %v3220_v2 = vadd.f32 %v3040_v30, %v582_v60 }
  0xfa   :  { %v694_v52 = vmax.f32 %v428_v45, 0.0  ;;  %2440 = vmatmul.mubr.f32.gmra.mrb[42].mxu1 %v692_v37  ;;  %v726_v4 = vmax.f32 %v3208_v59, 0.0 }
  0xfb   :  { %v693_v56 = vmax.f32 %v423_v49, 0.0  ;;  %v2319_v58 = vpop.f32.mrb[14].mxu0  ;;  %v725_v7 = vmax.f32 %v3220_v2, 0.0  ;;  %v2367_v8 = vpop.f32.mrb[14].mxu1 }
  0xfc   :  { %758 = vst [vmem:[%s3900_s7 + $0x68] sm:$0xff] %v694_v52  ;;  %v438_v62 = vadd.f32 %v2319_v58, %v3040_v30  ;;  %v432_v0 = vpop.f32.mrb[15].mxu0  ;;  %790 = vst [vmem:[%s3900_s7 + $0x168] sm:$0xff] %v726_v4  ;;  %v3234_v14 = vadd.f32 %v2367_v8, %v3040_v30  ;;  %v592_v15 = vpop.f32.mrb[15].mxu1 }
  0xfd   :  { %757 = vst [vmem:[%s3900_s7 + $0x60] sm:$0xff] %v693_v56  ;;  %v433_v3 = vadd.f32 %v3040_v30, %v432_v0  ;;  %2442 = vmatprep.mubr.f32.mxu1 %v693_v56  ;;  %789 = vst [vmem:[%s3900_s7 + $0x160] sm:$0xff] %v725_v7  ;;  %v3246_v19 = vadd.f32 %v3040_v30, %v592_v15 }
  0xfe   :  { %v696_v6 = vmax.f32 %v438_v62, 0.0  ;;  %2443 = vmatmul.mubr.f32.gmra.mrb[44].mxu1 %v694_v52  ;;  %v728_v22 = vmax.f32 %v3234_v14, 0.0 }
  0xff   :  { %v695_v10 = vmax.f32 %v433_v3, 0.0  ;;  %v2322_v12 = vpop.f32.mrb[16].mxu0  ;;  %v727_v26 = vmax.f32 %v3246_v19, 0.0  ;;  %v2370_v27 = vpop.f32.mrb[16].mxu1 }
 0x100   :  { %760 = vst [vmem:[%s3900_s7 + $0x78] sm:$0xff] %v696_v6  ;;  %v448_v16 = vadd.f32 %v2322_v12, %v3040_v30  ;;  %v442_v18 = vpop.f32.mrb[17].mxu0  ;;  %792 = vst [vmem:[%s3900_s7 + $0x178] sm:$0xff] %v728_v22  ;;  %v3260_v32 = vadd.f32 %v2370_v27, %v3040_v30  ;;  %v602_v33 = vpop.f32.mrb[17].mxu1 }
 0x101   :  { %759 = vst [vmem:[%s3900_s7 + $0x70] sm:$0xff] %v695_v10  ;;  %v443_v20 = vadd.f32 %v3040_v30, %v442_v18  ;;  %2445 = vmatprep.mubr.f32.mxu1 %v695_v10  ;;  %791 = vst [vmem:[%s3900_s7 + $0x170] sm:$0xff] %v727_v26  ;;  %v3272_v40 = vadd.f32 %v3040_v30, %v602_v33 }
 0x102   :  { %v698_v24 = vmax.f32 %v448_v16, 0.0  ;;  %2446 = vmatmul.mubr.f32.gmra.mrb[46].mxu1 %v696_v6  ;;  %v730_v42 = vmax.f32 %v3260_v32, 0.0 }
 0x103   :  { %v697_v28 = vmax.f32 %v443_v20, 0.0  ;;  %v2325_v31 = vpop.f32.mrb[18].mxu0  ;;  %v729_v45 = vmax.f32 %v3272_v40, 0.0  ;;  %v2373_v47 = vpop.f32.mrb[18].mxu1 }
 0x104   :  { %762 = vst [vmem:[%s3900_s7 + $0x88] sm:$0xff] %v698_v24  ;;  %v458_v35 = vadd.f32 %v2325_v31, %v3040_v30  ;;  %v452_v37 = vpop.f32.mrb[19].mxu0  ;;  %794 = vst [vmem:[%s3900_s7 + $0x188] sm:$0xff] %v730_v42  ;;  %v3286_v55 = vadd.f32 %v2373_v47, %v3040_v30  ;;  %v612_v56 = vpop.f32.mrb[19].mxu1 }
 0x105   :  { %761 = vst [vmem:[%s3900_s7 + $0x80] sm:$0xff] %v697_v28  ;;  %v453_v41 = vadd.f32 %v3040_v30, %v452_v37  ;;  %2448 = vmatprep.mubr.f32.mxu1 %v697_v28  ;;  %793 = vst [vmem:[%s3900_s7 + $0x180] sm:$0xff] %v729_v45  ;;  %v3298_v62 = vadd.f32 %v3040_v30, %v612_v56 }
 0x106   :  { %v700_v44 = vmax.f32 %v458_v35, 0.0  ;;  %2449 = vmatmul.mubr.f32.gmra.mrb[48].mxu1 %v698_v24  ;;  %v732_v3 = vmax.f32 %v3286_v55, 0.0 }
 0x107   :  { %v699_v49 = vmax.f32 %v453_v41, 0.0  ;;  %v2328_v52 = vpop.f32.mrb[20].mxu0  ;;  %v731_v8 = vmax.f32 %v3298_v62, 0.0  ;;  %v2376_v10 = vpop.f32.mrb[20].mxu1 }
 0x108   :  { %764 = vst [vmem:[%s3900_s7 + $0x98] sm:$0xff] %v700_v44  ;;  %v468_v58 = vadd.f32 %v2328_v52, %v3040_v30  ;;  %v462_v60 = vpop.f32.mrb[21].mxu0  ;;  %796 = vst [vmem:[%s3900_s7 + $0x198] sm:$0xff] %v732_v3  ;;  %v3312_v16 = vadd.f32 %v2376_v10, %v3040_v30  ;;  %v622_v18 = vpop.f32.mrb[21].mxu1 }
 0x109   :  { %763 = vst [vmem:[%s3900_s7 + $0x90] sm:$0xff] %v699_v49  ;;  %v463_v0 = vadd.f32 %v3040_v30, %v462_v60  ;;  %2451 = vmatprep.mubr.f32.mxu1 %v699_v49  ;;  %795 = vst [vmem:[%s3900_s7 + $0x190] sm:$0xff] %v731_v8  ;;  %v3324_v27 = vadd.f32 %v3040_v30, %v622_v18 }
 0x10a   :  { %v702_v6 = vmax.f32 %v468_v58, 0.0  ;;  %2452 = vmatmul.mubr.f32.gmra.mrb[50].mxu1 %v700_v44  ;;  %v3910_v31 = vmax.f32 %v3312_v16, 0.0 }
 0x10b   :  { %v701_v12 = vmax.f32 %v463_v0, 0.0  ;;  %v2331_v15 = vpop.f32.mrb[22].mxu0  ;;  %v733_v35 = vmax.f32 %v3324_v27, 0.0  ;;  %v2379_v37 = vpop.f32.mrb[22].mxu1 }
 0x10c   :  { %766 = vst [vmem:[%s3900_s7 + $0xa8] sm:$0xff] %v702_v6  ;;  %v478_v20 = vadd.f32 %v2331_v15, %v3040_v30  ;;  %v472_v24 = vpop.f32.mrb[23].mxu0  ;;  %798 = vst [vmem:[%s3900_s7 + $0x1a8] sm:$0xff] %v3910_v31  ;;  %v3338_v47 = vadd.f32 %v2379_v37, %v3040_v30  ;;  %v632_v49 = vpop.f32.mrb[23].mxu1 }
 0x10d   :  { %765 = vst [vmem:[%s3900_s7 + $0xa0] sm:$0xff] %v701_v12  ;;  %v473_v28 = vadd.f32 %v3040_v30, %v472_v24  ;;  %2454 = vmatprep.mubr.f32.mxu1 %v701_v12  ;;  %797 = vst [vmem:[%s3900_s7 + $0x1a0] sm:$0xff] %v733_v35  ;;  %v3350_v58 = vadd.f32 %v3040_v30, %v632_v49 }
 0x10e   :  { %v704_v33 = vmax.f32 %v478_v20, 0.0  ;;  %2455 = vmatmul.mubr.f32.gmra.mrb[52].mxu1 %v702_v6  ;;  %v3906_v0 = vmax.f32 %v3338_v47, 0.0  ;;  %v3913_v46 = vmax.f32 %v3338_v47, 0.0 }
 0x10f   :  { %v703_v41 = vmax.f32 %v473_v28, 0.0  ;;  %v2334_v44 = vpop.f32.mrb[24].mxu0  ;;  %v3907_v10 = vmax.f32 %v3350_v58, 0.0  ;;  %v2382_v12 = vpop.f32.mrb[24].mxu1  ;;  %v3912_v39 = vmax.f32 %v3350_v58, 0.0 }
 0x110   :  { %768 = vst [vmem:[%s3900_s7 + $0xb8] sm:$0xff] %v704_v33  ;;  %v488_v52 = vadd.f32 %v2334_v44, %v3040_v30  ;;  %v482_v56 = vpop.f32.mrb[25].mxu0  ;;  %800 = vst [vmem:[%s3900_s7 + $0x1b8] sm:$0xff] %v3906_v0  ;;  %v3364_v20 = vadd.f32 %v2382_v12, %v3040_v30  ;;  %v642_v24 = vpop.f32.mrb[25].mxu1 }
 0x111   :  { %767 = vst [vmem:[%s3900_s7 + $0xb0] sm:$0xff] %v703_v41  ;;  %v483_v60 = vadd.f32 %v3040_v30, %v482_v56  ;;  %2457 = vmatprep.mubr.f32.mxu1 %v703_v41  ;;  %799 = vst [vmem:[%s3900_s7 + $0x1b0] sm:$0xff] %v3907_v10  ;;  %v3376_v37 = vadd.f32 %v3040_v30, %v642_v24 }
 0x112   :  { %v706_v6 = vmax.f32 %v488_v52, 0.0  ;;  %2458 = vmatmul.mubr.f32.gmra.mrb[54].mxu1 %v704_v33  ;;  %v3905_v44 = vmax.f32 %v3364_v20, 0.0 }
 0x113   :  { %v705_v15 = vmax.f32 %v483_v60, 0.0  ;;  %v2337_v18 = vpop.f32.mrb[26].mxu0  ;;  %v3908_v52 = vmax.f32 %v3376_v37, 0.0  ;;  %v2385_v56 = vpop.f32.mrb[26].mxu1 }
 0x114   :  { %770 = vst [vmem:[%s3900_s7 + $0xc8] sm:$0xff] %v706_v6  ;;  %v498_v28 = vadd.f32 %v2337_v18, %v3040_v30  ;;  %v492_v33 = vpop.f32.mrb[27].mxu0  ;;  %802 = vst [vmem:[%s3900_s7 + $0x1c8] sm:$0xff] %v3905_v44  ;;  %v3390_v18 = vadd.f32 %v2385_v56, %v3040_v30  ;;  %v652_v24 = vpop.f32.mrb[27].mxu1 }
 0x115   :  { %769 = vst [vmem:[%s3900_s7 + $0xc0] sm:$0xff] %v705_v15  ;;  %v493_v41 = vadd.f32 %v3040_v30, %v492_v33  ;;  %2460 = vmatprep.mubr.f32.mxu1 %v705_v15  ;;  %801 = vst [vmem:[%s3900_s7 + $0x1c0] sm:$0xff] %v3908_v52 }
 0x116   :  { %v708_v49 = vmax.f32 %v498_v28, 0.0  ;;  %2461 = vmatmul.mubr.f32.gmra.mrb[56].mxu1 %v706_v6  ;;  %v3402_v28 = vadd.f32 %v3040_v30, %v652_v24  ;;  %v3916_v57 = vmax.f32 %v3390_v18, 0.0 }
 0x117   :  { %v707_v60 = vmax.f32 %v493_v41, 0.0  ;;  %v2340_v12 = vpop.f32.mrb[28].mxu0  ;;  %v3909_v41 = vmax.f32 %v3390_v18, 0.0  ;;  %v2388_v44 = vpop.f32.mrb[28].mxu1 }
 0x118   :  { %772 = vst [vmem:[%s3900_s7 + $0xd8] sm:$0xff] %v708_v49  ;;  %v508_v6 = vadd.f32 %v2340_v12, %v3040_v30  ;;  %v502_v15 = vpop.f32.mrb[29].mxu0  ;;  %v739_v12 = vmax.f32 %v3402_v28, 0.0  ;;  %v668_v24 = vadd.f32 %v2388_v44, %v3040_v30  ;;  %v662_v52 = vpop.f32.mrb[29].mxu1 }
 0x119   :  { %771 = vst [vmem:[%s3900_s7 + $0xd0] sm:$0xff] %v707_v60  ;;  %v503_v33 = vadd.f32 %v3040_v30, %v502_v15  ;;  %2463 = vmatprep.mubr.f32.mxu1 %v707_v60  ;;  %804 = vst [vmem:[%s3900_s7 + $0x1d8] sm:$0xff] %v3909_v41 }
 0x11a   :  { %v710_v56 = vmax.f32 %v508_v6, 0.0  ;;  %2464 = vmatmul.mubr.f32.gmra.mrb[58].mxu1 %v708_v49  ;;  %803 = vst [vmem:[%s3900_s7 + $0x1d0] sm:$0xff] %v739_v12  ;;  %v663_v6 = vadd.f32 %v3040_v30, %v662_v52  ;;  %v742_v15 = vmax.f32 %v668_v24, 0.0 }
 0x11b   :  { %v709_v0 = vmax.f32 %v503_v33, 0.0  ;;  %v2343_v10 = vpop.f32.mrb[30].mxu0  ;;  %v2391_v41 = vpop.f32.mrb[30].mxu1 }
 0x11c   :  { %774 = vst [vmem:[%s3900_s7 + $0xe8] sm:$0xff] %v710_v56  ;;  %v518_v49 = vadd.f32 %v2343_v10, %v3040_v30  ;;  %v512_v60 = vpop.f32.mrb[31].mxu0  ;;  %v741_v33 = vmax.f32 %v663_v6, 0.0  ;;  %806 = vst [vmem:[%s3900_s7 + $0x1e8] sm:$0xff] %v742_v15  ;;  %v678_v31 = vadd.f32 %v2391_v41, %v3040_v30  ;;  %v672_v52 = vpop.f32.mrb[31].mxu1 }
 0x11d   :  { %773 = vst [vmem:[%s3900_s7 + $0xe0] sm:$0xff] %v709_v0  ;;  %v513_v44 = vadd.f32 %v3040_v30, %v512_v60  ;;  %2466 = vmatprep.mubr.f32.mxu1 %v709_v0  ;;  %v673_v0 = vadd.f32 %v3040_v30, %v672_v52  ;;  %v3911_v30 = vmax.f32 %v3312_v16, 0.0 }
 0x11e   :  { %v712_v28 = vmax.f32 %v518_v49, 0.0  ;;  %2467 = vmatmul.mubr.f32.gmra.mrb[60].mxu1 %v710_v56  ;;  %805 = vst [vmem:[%s3900_s7 + $0x1e0] sm:$0xff] %v741_v33  ;;  %v744_v56 = vmax.f32 %v678_v31, 0.0 }
 0x11f   :  { %v711_v10 = vmax.f32 %v513_v44, 0.0  ;;  %v743_v24 = vmax.f32 %v673_v0, 0.0 }
 0x120   :  { %776 = vst [vmem:[%s3900_s7 + $0xf8] sm:$0xff] %v712_v28  ;;  %808 = vst [vmem:[%s3900_s7 + $0x1f8] sm:$0xff] %v744_v56 }
 0x121   :  { %775 = vst [vmem:[%s3900_s7 + $0xf0] sm:$0xff] %v711_v10  ;;  %2469 = vmatprep.mubr.f32.mxu1 %v711_v10  ;;  %807 = vst [vmem:[%s3900_s7 + $0x1f0] sm:$0xff] %v743_v24 }
 0x122   :  { %2470 = vmatmul.mubr.f32.gmra.mrb[62].mxu1 %v712_v28 }
 0x123   :  { %2472 = vmatprep.mubr.f32.mxu1 %v713_v53  ;;  %v3915_v53 = vmax.f32 %v3364_v20, 0.0 }
 0x126   :  { %2473 = vmatmul.mubr.f32.gmra.mrb[64].mxu1 %v714_v50  ;;  %v3914_v50 = vmax.f32 %v3376_v37, 0.0 }
 0x127   :  { %2475 = vmatprep.mubr.f32.mxu1 %v715_v1 }
 0x12a   :  { %2476 = vmatmul.mubr.f32.gmra.mrb[66].mxu1 %v716_v63 }
 0x12b   :  { %2478 = vmatprep.mubr.f32.mxu1 %v717_v13 }
 0x12e   :  { %2479 = vmatmul.mubr.f32.gmra.mrb[68].mxu1 %v718_v11 }
 0x12f   :  { %2481 = vmatprep.mubr.f32.mxu1 %v719_v25 }
 0x132   :  { %2482 = vmatmul.mubr.f32.gmra.mrb[70].mxu1 %v720_v23 }
 0x133   :  { %2484 = vmatprep.mubr.f32.mxu1 %v721_v38 }
 0x136   :  { %2485 = vmatmul.mubr.f32.gmra.mrb[72].mxu1 %v722_v36 }
 0x137   :  { %2487 = vmatprep.mubr.f32.mxu1 %v723_v54 }
 0x13a   :  { %2488 = vmatmul.mubr.f32.gmra.mrb[74].mxu1 %v724_v51 }
 0x13b   :  { %2490 = vmatprep.mubr.f32.mxu1 %v725_v7 }
 0x13e   :  { %2491 = vmatmul.mubr.f32.gmra.mrb[76].mxu1 %v726_v4 }
 0x13f   :  { %2493 = vmatprep.mubr.f32.mxu1 %v727_v26 }
 0x142   :  { %2494 = vmatmul.mubr.f32.gmra.mrb[78].mxu1 %v728_v22 }
 0x143   :  { %2496 = vmatprep.mubr.f32.mxu1 %v729_v45 }
 0x146   :  { %2497 = vmatmul.mubr.f32.gmra.mrb[80].mxu1 %v730_v42 }
 0x147   :  { %2499 = vmatprep.mubr.f32.mxu1 %v731_v8 }
 0x14a   :  { %2500 = vmatmul.mubr.f32.gmra.mrb[82].mxu1 %v732_v3 }
 0x14b   :  { %2502 = vmatprep.mubr.f32.mxu1 %v733_v35 }
 0x14e   :  { %2503 = vmatmul.mubr.f32.gmra.mrb[84].mxu1 %v3911_v30 }
 0x14f   :  { %2505 = vmatprep.mubr.f32.mxu1 %v3912_v39 }
 0x152   :  { %2506 = vmatmul.mubr.f32.gmra.mrb[86].mxu1 %v3913_v46 }
 0x153   :  { %2508 = vmatprep.mubr.f32.mxu1 %v3914_v50 }
 0x156   :  { %2509 = vmatmul.mubr.f32.gmra.mrb[88].mxu1 %v3915_v53 }
 0x157   :  { %2511 = vmatprep.mubr.f32.mxu1 %v739_v12 }
 0x15a   :  { %2512 = vmatmul.mubr.f32.gmra.mrb[90].mxu1 %v3916_v57 }
 0x15b   :  { %2514 = vmatprep.mubr.f32.mxu1 %v741_v33 }
 0x15e   :  { %2515 = vmatmul.mubr.f32.gmra.mrb[92].mxu1 %v742_v15 }
 0x15f   :  { %2517 = vmatprep.mubr.f32.mxu1 %v743_v24 }
 0x162   :  { %2518 = vmatmul.mubr.f32.gmra.mrb[94].mxu1 %v744_v56 }
 0x1b9   :  { %v2426_v63 = vpop.f32.mrb[32].mxu1 }
 0x1ba   :  { %v904_v1 = vadd.f32 %v2426_v63, %v3505_v61  ;;  %v898_v5 = vpop.f32.mrb[33].mxu1 }
 0x1bb   :  { %v899_v9 = vadd.f32 %v3505_v61, %v898_v5 }
 0x1bc   :  { %v1218_v17 = vmax.f32 %v904_v1, 0.0 }
 0x1bd   :  { %v1217_v11 = vmax.f32 %v899_v9, 0.0  ;;  %v2429_v13 = vpop.f32.mrb[34].mxu1 }
 0x1be   :  { %v914_v21 = vadd.f32 %v2429_v13, %v3505_v61  ;;  %v908_v23 = vpop.f32.mrb[35].mxu1 }
 0x1bf   :  { %v909_v25 = vadd.f32 %v3505_v61, %v908_v23  ;;  %2528 = vmatprep.mubr.msk.f32.mxu0 %vm103_vm0, %v1217_v11 }
 0x1c0   :  { %2529 = vmatmul.mubr.msk.f32.vlgmr.msra.gmra.mrb[32].mxu0 %vm103_vm0, %v1218_v17  ;;  %v1220_v36 = vmax.f32 %v914_v21, 0.0 }
 0x1c1   :  { %v1219_v29 = vmax.f32 %v909_v25, 0.0  ;;  %v2432_v34 = vpop.f32.mrb[36].mxu1 }
 0x1c2   :  { %v924_v38 = vadd.f32 %v2432_v34, %v3505_v61  ;;  %v918_v43 = vpop.f32.mrb[37].mxu1 }
 0x1c3   :  { %v919_v48 = vadd.f32 %v3505_v61, %v918_v43  ;;  %2531 = vmatprep.mubr.msk.f32.mxu0 %vm103_vm0, %v1219_v29 }
 0x1c4   :  { %2532 = vmatmul.mubr.msk.f32.gmra.mrb[34].mxu0 %vm103_vm0, %v1220_v36  ;;  %v1222_v59 = vmax.f32 %v924_v38, 0.0 }
 0x1c5   :  { %v1221_v51 = vmax.f32 %v919_v48, 0.0  ;;  %v2435_v54 = vpop.f32.mrb[38].mxu1 }
 0x1c6   :  { %v934_v2 = vadd.f32 %v2435_v54, %v3505_v61  ;;  %v928_v4 = vpop.f32.mrb[39].mxu1 }
 0x1c7   :  { %v929_v7 = vadd.f32 %v3505_v61, %v928_v4  ;;  %2534 = vmatprep.mubr.msk.f32.mxu0 %vm103_vm0, %v1221_v51 }
 0x1c8   :  { %2535 = vmatmul.mubr.msk.f32.gmra.mrb[36].mxu0 %vm103_vm0, %v1222_v59  ;;  %v1224_v22 = vmax.f32 %v934_v2, 0.0 }
 0x1c9   :  { %v1223_v14 = vmax.f32 %v929_v7, 0.0  ;;  %v2438_v19 = vpop.f32.mrb[40].mxu1 }
 0x1ca   :  { %v944_v26 = vadd.f32 %v2438_v19, %v3505_v61  ;;  %v938_v32 = vpop.f32.mrb[41].mxu1 }
 0x1cb   :  { %v939_v40 = vadd.f32 %v3505_v61, %v938_v32  ;;  %2537 = vmatprep.mubr.msk.f32.mxu0 %vm103_vm0, %v1223_v14 }
 0x1cc   :  { %2538 = vmatmul.mubr.msk.f32.gmra.mrb[38].mxu0 %vm103_vm0, %v1224_v22  ;;  %v1226_v55 = vmax.f32 %v944_v26, 0.0 }
 0x1cd   :  { %v1225_v42 = vmax.f32 %v939_v40, 0.0  ;;  %v2441_v45 = vpop.f32.mrb[42].mxu1 }
 0x1ce   :  { %v954_v62 = vadd.f32 %v2441_v45, %v3505_v61  ;;  %v948_v3 = vpop.f32.mrb[43].mxu1 }
 0x1cf   :  { %v949_v8 = vadd.f32 %v3505_v61, %v948_v3  ;;  %2540 = vmatprep.mubr.msk.f32.mxu0 %vm103_vm0, %v1225_v42 }
 0x1d0   :  { %2541 = vmatmul.mubr.msk.f32.gmra.mrb[40].mxu0 %vm103_vm0, %v1226_v55  ;;  %v1228_v31 = vmax.f32 %v954_v62, 0.0 }
 0x1d1   :  { %v1227_v16 = vmax.f32 %v949_v8, 0.0  ;;  %v2444_v27 = vpop.f32.mrb[44].mxu1 }
 0x1d2   :  { %v964_v35 = vadd.f32 %v2444_v27, %v3505_v61  ;;  %v958_v47 = vpop.f32.mrb[45].mxu1 }
 0x1d3   :  { %v959_v58 = vadd.f32 %v3505_v61, %v958_v47  ;;  %2543 = vmatprep.mubr.msk.f32.mxu0 %vm103_vm0, %v1227_v16 }
 0x1d4   :  { %2544 = vmatmul.mubr.msk.f32.gmra.mrb[42].mxu0 %vm103_vm0, %v1228_v31  ;;  %v1230_v18 = vmax.f32 %v964_v35, 0.0 }
 0x1d5   :  { %v1229_v20 = vmax.f32 %v959_v58, 0.0  ;;  %v2447_v37 = vpop.f32.mrb[46].mxu1 }
 0x1d6   :  { %v974_v41 = vadd.f32 %v2447_v37, %v3505_v61  ;;  %v968_v12 = vpop.f32.mrb[47].mxu1 }
 0x1d7   :  { %v969_v49 = vadd.f32 %v3505_v61, %v968_v12  ;;  %2546 = vmatprep.mubr.msk.f32.mxu0 %vm103_vm0, %v1229_v20 }
 0x1d8   :  { %2547 = vmatmul.mubr.msk.f32.gmra.mrb[44].mxu0 %vm103_vm0, %v1230_v18  ;;  %v1232_v44 = vmax.f32 %v974_v41, 0.0 }
 0x1d9   :  { %v1231_v60 = vmax.f32 %v969_v49, 0.0  ;;  %v2450_v6 = vpop.f32.mrb[48].mxu1 }
 0x1da   :  { %v984_v15 = vadd.f32 %v2450_v6, %v3505_v61  ;;  %v978_v28 = vpop.f32.mrb[49].mxu1 }
 0x1db   :  { %v979_v33 = vadd.f32 %v3505_v61, %v978_v28  ;;  %2549 = vmatprep.mubr.msk.f32.mxu0 %vm103_vm0, %v1231_v60 }
 0x1dc   :  { %2550 = vmatmul.mubr.msk.f32.gmra.mrb[46].mxu0 %vm103_vm0, %v1232_v44  ;;  %v1234_v0 = vmax.f32 %v984_v15, 0.0 }
 0x1dd   :  { %v1233_v10 = vmax.f32 %v979_v33, 0.0  ;;  %v2453_v52 = vpop.f32.mrb[50].mxu1 }
 0x1de   :  { %v994_v56 = vadd.f32 %v2453_v52, %v3505_v61  ;;  %v988_v24 = vpop.f32.mrb[51].mxu1 }
 0x1df   :  { %v989_v30 = vadd.f32 %v3505_v61, %v988_v24  ;;  %2552 = vmatprep.mubr.msk.f32.mxu0 %vm103_vm0, %v1233_v10 }
 0x1e0   :  { %2553 = vmatmul.mubr.msk.f32.gmra.mrb[48].mxu0 %vm103_vm0, %v1234_v0  ;;  %v1236_v50 = vmax.f32 %v994_v56, 0.0 }
 0x1e1   :  { %v1235_v39 = vmax.f32 %v989_v30, 0.0  ;;  %v2456_v46 = vpop.f32.mrb[52].mxu1 }
 0x1e2   :  { %v1004_v53 = vadd.f32 %v2456_v46, %v3505_v61  ;;  %v998_v57 = vpop.f32.mrb[53].mxu1 }
 0x1e3   :  { %v999_v63 = vadd.f32 %v3505_v61, %v998_v57  ;;  %2555 = vmatprep.mubr.msk.f32.mxu0 %vm103_vm0, %v1235_v39 }
 0x1e4   :  { %2556 = vmatmul.mubr.msk.f32.gmra.mrb[50].mxu0 %vm103_vm0, %v1236_v50  ;;  %v1238_v9 = vmax.f32 %v1004_v53, 0.0 }
 0x1e5   :  { %v1237_v1 = vmax.f32 %v999_v63, 0.0  ;;  %v2459_v5 = vpop.f32.mrb[54].mxu1 }
 0x1e6   :  { %v1014_v11 = vadd.f32 %v2459_v5, %v3505_v61  ;;  %v1008_v13 = vpop.f32.mrb[55].mxu1 }
 0x1e7   :  { %v1009_v17 = vadd.f32 %v3505_v61, %v1008_v13  ;;  %2558 = vmatprep.mubr.msk.f32.mxu0 %vm103_vm0, %v1237_v1 }
 0x1e8   :  { %2559 = vmatmul.mubr.msk.f32.gmra.mrb[52].mxu0 %vm103_vm0, %v1238_v9  ;;  %v1240_v25 = vmax.f32 %v1014_v11, 0.0 }
 0x1e9   :  { %v1239_v21 = vmax.f32 %v1009_v17, 0.0  ;;  %v2462_v23 = vpop.f32.mrb[56].mxu1 }
 0x1ea   :  { %v1024_v29 = vadd.f32 %v2462_v23, %v3505_v61  ;;  %v1018_v34 = vpop.f32.mrb[57].mxu1 }
 0x1eb   :  { %v1019_v36 = vadd.f32 %v3505_v61, %v1018_v34  ;;  %2561 = vmatprep.mubr.msk.f32.mxu0 %vm103_vm0, %v1239_v21 }
 0x1ec   :  { %2562 = vmatmul.mubr.msk.f32.gmra.mrb[54].mxu0 %vm103_vm0, %v1240_v25  ;;  %v1242_v48 = vmax.f32 %v1024_v29, 0.0 }
 0x1ed   :  { %v1241_v38 = vmax.f32 %v1019_v36, 0.0  ;;  %v2465_v43 = vpop.f32.mrb[58].mxu1 }
 0x1ee   :  { %v1034_v51 = vadd.f32 %v2465_v43, %v3505_v61  ;;  %v1028_v54 = vpop.f32.mrb[59].mxu1 }
 0x1ef   :  { %v1029_v59 = vadd.f32 %v3505_v61, %v1028_v54  ;;  %2564 = vmatprep.mubr.msk.f32.mxu0 %vm103_vm0, %v1241_v38 }
 0x1f0   :  { %2565 = vmatmul.mubr.msk.f32.gmra.mrb[56].mxu0 %vm103_vm0, %v1242_v48  ;;  %v1244_v7 = vmax.f32 %v1034_v51, 0.0 }
 0x1f1   :  { %v1243_v2 = vmax.f32 %v1029_v59, 0.0  ;;  %v2468_v4 = vpop.f32.mrb[60].mxu1 }
 0x1f2   :  { %v1044_v14 = vadd.f32 %v2468_v4, %v3505_v61  ;;  %v1038_v19 = vpop.f32.mrb[61].mxu1 }
 0x1f3   :  { %v1039_v22 = vadd.f32 %v3505_v61, %v1038_v19  ;;  %2567 = vmatprep.mubr.msk.f32.mxu0 %vm103_vm0, %v1243_v2 }
 0x1f4   :  { %2568 = vmatmul.mubr.msk.f32.gmra.mrb[58].mxu0 %vm103_vm0, %v1244_v7  ;;  %v1246_v40 = vmax.f32 %v1044_v14, 0.0 }
 0x1f5   :  { %v1245_v26 = vmax.f32 %v1039_v22, 0.0  ;;  %v2471_v32 = vpop.f32.mrb[62].mxu1 }
 0x1f6   :  { %v1054_v42 = vadd.f32 %v2471_v32, %v3505_v61  ;;  %v1048_v45 = vpop.f32.mrb[63].mxu1 }
 0x1f7   :  { %v1049_v55 = vadd.f32 %v3505_v61, %v1048_v45  ;;  %2570 = vmatprep.mubr.msk.f32.mxu0 %vm103_vm0, %v1245_v26 }
 0x1f8   :  { %2571 = vmatmul.mubr.msk.f32.gmra.mrb[60].mxu0 %vm103_vm0, %v1246_v40  ;;  %v1248_v8 = vmax.f32 %v1054_v42, 0.0 }
 0x1f9   :  { %v1247_v62 = vmax.f32 %v1049_v55, 0.0  ;;  %v2474_v3 = vpop.f32.mrb[64].mxu1 }
 0x1fa   :  { %v1064_v16 = vadd.f32 %v2474_v3, %v3505_v61  ;;  %v1058_v27 = vpop.f32.mrb[65].mxu1 }
 0x1fb   :  { %v1059_v31 = vadd.f32 %v3505_v61, %v1058_v27  ;;  %2573 = vmatprep.mubr.msk.f32.mxu0 %vm103_vm0, %v1247_v62 }
 0x1fc   :  { %2574 = vmatmul.mubr.msk.f32.gmra.mrb[62].mxu0 %vm103_vm0, %v1248_v8  ;;  %v1250_v58 = vmax.f32 %v1064_v16, 0.0 }
 0x1fd   :  { %v1249_v35 = vmax.f32 %v1059_v31, 0.0  ;;  %v2477_v47 = vpop.f32.mrb[66].mxu1 }
 0x1fe   :  { %v1074_v20 = vadd.f32 %v2477_v47, %v3505_v61  ;;  %v1068_v37 = vpop.f32.mrb[67].mxu1 }
 0x1ff   :  { %v1069_v18 = vadd.f32 %v3505_v61, %v1068_v37  ;;  %2576 = vmatprep.mubr.msk.f32.mxu0 %vm103_vm0, %v1249_v35 }
 0x200   :  { %2577 = vmatmul.mubr.msk.f32.gmra.mrb[64].mxu0 %vm103_vm0, %v1250_v58  ;;  %v1252_v49 = vmax.f32 %v1074_v20, 0.0 }
 0x201   :  { %v1251_v41 = vmax.f32 %v1069_v18, 0.0  ;;  %v2480_v12 = vpop.f32.mrb[68].mxu1 }
 0x202   :  { %v1084_v60 = vadd.f32 %v2480_v12, %v3505_v61  ;;  %v1078_v6 = vpop.f32.mrb[69].mxu1 }
 0x203   :  { %v1079_v44 = vadd.f32 %v3505_v61, %v1078_v6  ;;  %2579 = vmatprep.mubr.msk.f32.mxu0 %vm103_vm0, %v1251_v41 }
 0x204   :  { %2580 = vmatmul.mubr.msk.f32.gmra.mrb[66].mxu0 %vm103_vm0, %v1252_v49  ;;  %v1254_v33 = vmax.f32 %v1084_v60, 0.0 }
 0x205   :  { %v1253_v15 = vmax.f32 %v1079_v44, 0.0  ;;  %v2483_v28 = vpop.f32.mrb[70].mxu1 }
 0x206   :  { %v1094_v10 = vadd.f32 %v2483_v28, %v3505_v61  ;;  %v1088_v52 = vpop.f32.mrb[71].mxu1 }
 0x207   :  { %v1089_v0 = vadd.f32 %v3505_v61, %v1088_v52  ;;  %2582 = vmatprep.mubr.msk.f32.mxu0 %vm103_vm0, %v1253_v15 }
 0x208   :  { %2583 = vmatmul.mubr.msk.f32.gmra.mrb[68].mxu0 %vm103_vm0, %v1254_v33  ;;  %v1256_v30 = vmax.f32 %v1094_v10, 0.0 }
 0x209   :  { %v1255_v56 = vmax.f32 %v1089_v0, 0.0  ;;  %v2486_v24 = vpop.f32.mrb[72].mxu1 }
 0x20a   :  { %v1104_v39 = vadd.f32 %v2486_v24, %v3505_v61  ;;  %v1098_v46 = vpop.f32.mrb[73].mxu1 }
 0x20b   :  { %v1099_v50 = vadd.f32 %v3505_v61, %v1098_v46  ;;  %2585 = vmatprep.mubr.msk.f32.mxu0 %vm103_vm0, %v1255_v56 }
 0x20c   :  { %2586 = vmatmul.mubr.msk.f32.gmra.mrb[70].mxu0 %vm103_vm0, %v1256_v30  ;;  %v1258_v63 = vmax.f32 %v1104_v39, 0.0 }
 0x20d   :  { %v1257_v53 = vmax.f32 %v1099_v50, 0.0  ;;  %v2489_v57 = vpop.f32.mrb[74].mxu1 }
 0x20e   :  { %v1114_v1 = vadd.f32 %v2489_v57, %v3505_v61  ;;  %v1108_v5 = vpop.f32.mrb[75].mxu1 }
 0x20f   :  { %v1109_v9 = vadd.f32 %v3505_v61, %v1108_v5  ;;  %2588 = vmatprep.mubr.msk.f32.mxu0 %vm103_vm0, %v1257_v53 }
 0x210   :  { %2589 = vmatmul.mubr.msk.f32.gmra.mrb[72].mxu0 %vm103_vm0, %v1258_v63  ;;  %v1260_v17 = vmax.f32 %v1114_v1, 0.0 }
 0x211   :  { %v1259_v11 = vmax.f32 %v1109_v9, 0.0  ;;  %v2492_v13 = vpop.f32.mrb[76].mxu1  ;;  %v3638_v9 = vld [vmem:[%s3903_s6] ss:$0 sm:$0xff] }
 0x212   :  { %v1124_v21 = vadd.f32 %v2492_v13, %v3505_v61  ;;  %v1118_v23 = vpop.f32.mrb[77].mxu1 }
 0x213   :  { %v1119_v25 = vadd.f32 %v3505_v61, %v1118_v23  ;;  %2591 = vmatprep.mubr.msk.f32.mxu0 %vm103_vm0, %v1259_v11 }
 0x214   :  { %2592 = vmatmul.mubr.msk.f32.gmra.mrb[74].mxu0 %vm103_vm0, %v1260_v17  ;;  %v1262_v36 = vmax.f32 %v1124_v21, 0.0 }
 0x215   :  { %v1261_v29 = vmax.f32 %v1119_v25, 0.0  ;;  %v2495_v34 = vpop.f32.mrb[78].mxu1 }
 0x216   :  { %v1134_v38 = vadd.f32 %v2495_v34, %v3505_v61  ;;  %v1128_v43 = vpop.f32.mrb[79].mxu1 }
 0x217   :  { %v1129_v48 = vadd.f32 %v3505_v61, %v1128_v43  ;;  %2594 = vmatprep.mubr.msk.f32.mxu0 %vm103_vm0, %v1261_v29 }
 0x218   :  { %2595 = vmatmul.mubr.msk.f32.gmra.mrb[76].mxu0 %vm103_vm0, %v1262_v36  ;;  %v1264_v59 = vmax.f32 %v1134_v38, 0.0 }
 0x219   :  { %v1263_v51 = vmax.f32 %v1129_v48, 0.0  ;;  %v2498_v54 = vpop.f32.mrb[80].mxu1 }
 0x21a   :  { %v1144_v2 = vadd.f32 %v2498_v54, %v3505_v61  ;;  %v1138_v4 = vpop.f32.mrb[81].mxu1 }
 0x21b   :  { %v1139_v7 = vadd.f32 %v3505_v61, %v1138_v4  ;;  %2597 = vmatprep.mubr.msk.f32.mxu0 %vm103_vm0, %v1263_v51 }
 0x21c   :  { %2598 = vmatmul.mubr.msk.f32.gmra.mrb[78].mxu0 %vm103_vm0, %v1264_v59  ;;  %v1266_v22 = vmax.f32 %v1144_v2, 0.0 }
 0x21d   :  { %v1265_v14 = vmax.f32 %v1139_v7, 0.0  ;;  %v2501_v19 = vpop.f32.mrb[82].mxu1 }
 0x21e   :  { %v1154_v26 = vadd.f32 %v2501_v19, %v3505_v61  ;;  %v1148_v32 = vpop.f32.mrb[83].mxu1 }
 0x21f   :  { %v1149_v40 = vadd.f32 %v3505_v61, %v1148_v32  ;;  %2600 = vmatprep.mubr.msk.f32.mxu0 %vm103_vm0, %v1265_v14 }
 0x220   :  { %2601 = vmatmul.mubr.msk.f32.gmra.mrb[80].mxu0 %vm103_vm0, %v1266_v22  ;;  %v1268_v55 = vmax.f32 %v1154_v26, 0.0 }
 0x221   :  { %v1267_v42 = vmax.f32 %v1149_v40, 0.0  ;;  %v2504_v45 = vpop.f32.mrb[84].mxu1 }
 0x222   :  { %v1164_v62 = vadd.f32 %v2504_v45, %v3505_v61  ;;  %v1158_v3 = vpop.f32.mrb[85].mxu1 }
 0x223   :  { %v1159_v8 = vadd.f32 %v3505_v61, %v1158_v3  ;;  %2603 = vmatprep.mubr.msk.f32.mxu0 %vm103_vm0, %v1267_v42 }
 0x224   :  { %2604 = vmatmul.mubr.msk.f32.gmra.mrb[82].mxu0 %vm103_vm0, %v1268_v55  ;;  %v1270_v31 = vmax.f32 %v1164_v62, 0.0 }
 0x225   :  { %v1269_v16 = vmax.f32 %v1159_v8, 0.0  ;;  %v2507_v27 = vpop.f32.mrb[86].mxu1 }
 0x226   :  { %v1174_v35 = vadd.f32 %v2507_v27, %v3505_v61  ;;  %v1168_v47 = vpop.f32.mrb[87].mxu1 }
 0x227   :  { %v1169_v58 = vadd.f32 %v3505_v61, %v1168_v47  ;;  %2606 = vmatprep.mubr.msk.f32.mxu0 %vm103_vm0, %v1269_v16 }
 0x228   :  { %2607 = vmatmul.mubr.msk.f32.gmra.mrb[84].mxu0 %vm103_vm0, %v1270_v31  ;;  %v1272_v18 = vmax.f32 %v1174_v35, 0.0 }
 0x229   :  { %v1271_v20 = vmax.f32 %v1169_v58, 0.0  ;;  %v2510_v37 = vpop.f32.mrb[88].mxu1 }
 0x22a   :  { %v1184_v41 = vadd.f32 %v2510_v37, %v3505_v61  ;;  %v1178_v12 = vpop.f32.mrb[89].mxu1 }
 0x22b   :  { %v1179_v49 = vadd.f32 %v3505_v61, %v1178_v12  ;;  %2609 = vmatprep.mubr.msk.f32.mxu0 %vm103_vm0, %v1271_v20 }
 0x22c   :  { %2610 = vmatmul.mubr.msk.f32.gmra.mrb[86].mxu0 %vm103_vm0, %v1272_v18  ;;  %v1274_v44 = vmax.f32 %v1184_v41, 0.0 }
 0x22d   :  { %v1273_v60 = vmax.f32 %v1179_v49, 0.0  ;;  %v2513_v6 = vpop.f32.mrb[90].mxu1 }
 0x22e   :  { %v1194_v15 = vadd.f32 %v2513_v6, %v3505_v61  ;;  %v1188_v28 = vpop.f32.mrb[91].mxu1 }
 0x22f   :  { %v1189_v33 = vadd.f32 %v3505_v61, %v1188_v28  ;;  %2612 = vmatprep.mubr.msk.f32.mxu0 %vm103_vm0, %v1273_v60 }
 0x230   :  { %2613 = vmatmul.mubr.msk.f32.gmra.mrb[88].mxu0 %vm103_vm0, %v1274_v44  ;;  %v1276_v0 = vmax.f32 %v1194_v15, 0.0 }
 0x231   :  { %v1275_v10 = vmax.f32 %v1189_v33, 0.0  ;;  %v2516_v52 = vpop.f32.mrb[92].mxu1 }
 0x232   :  { %v1204_v56 = vadd.f32 %v2516_v52, %v3505_v61  ;;  %v1198_v24 = vpop.f32.mrb[93].mxu1 }
 0x233   :  { %v1199_v30 = vadd.f32 %v3505_v61, %v1198_v24  ;;  %2615 = vmatprep.mubr.msk.f32.mxu0 %vm103_vm0, %v1275_v10 }
 0x234   :  { %2616 = vmatmul.mubr.msk.f32.gmra.mrb[90].mxu0 %vm103_vm0, %v1276_v0  ;;  %v1278_v50 = vmax.f32 %v1204_v56, 0.0 }
 0x235   :  { %v1277_v39 = vmax.f32 %v1199_v30, 0.0  ;;  %v2519_v46 = vpop.f32.mrb[94].mxu1 }
 0x236   :  { %v1214_v53 = vadd.f32 %v2519_v46, %v3505_v61  ;;  %v1208_v57 = vpop.f32.mrb[95].mxu1 }
 0x237   :  { %v1209_v63 = vadd.f32 %v3505_v61, %v1208_v57  ;;  %2618 = vmatprep.mubr.msk.f32.mxu0 %vm103_vm0, %v1277_v39 }
 0x238   :  { %2619 = vmatmul.mubr.msk.f32.gmra.mrb[92].mxu0 %vm103_vm0, %v1278_v50  ;;  %v1280_v5 = vmax.f32 %v1214_v53, 0.0 }
 0x239   :  { %v1279_v1 = vmax.f32 %v1209_v63, 0.0 }
 0x23b   :  { %2621 = vmatprep.mubr.msk.f32.mxu0 %vm103_vm0, %v1279_v1 }
 0x23c   :  { %2622 = vmatmul.mubr.msk.f32.gmra.mrb[94].mxu0 %vm103_vm0, %v1280_v5 }
 0x293   :  { %v2530_v11 = vpop.f32.mrb[32].mxu0 }
 0x294   :  { %v1556_v13 = vadd.f32 %v2530_v11, %v3638_v9  ;;  %v1550_v17 = vpop.f32.mrb[33].mxu0 }
 0x295   :  { %v1551_v61 = vadd.f32 %v3638_v9, %v1550_v17 }
 0x296   :  { %1870 = vst [vmem:[%s3904_s8 + $0x8] sm:$0xff] %v1556_v13 }
 0x297   :  { %1869 = vst [vmem:[%s3904_s8] sm:$0xff] %v1551_v61  ;;  %v2533_v21 = vpop.f32.mrb[34].mxu0 }
 0x298   :  { %v1566_v23 = vadd.f32 %v2533_v21, %v3638_v9  ;;  %v1560_v25 = vpop.f32.mrb[35].mxu0 }
 0x299   :  { %v1561_v29 = vadd.f32 %v3638_v9, %v1560_v25 }
 0x29a   :  { %1872 = vst [vmem:[%s3904_s8 + $0x18] sm:$0xff] %v1566_v23 }
 0x29b   :  { %1871 = vst [vmem:[%s3904_s8 + $0x10] sm:$0xff] %v1561_v29  ;;  %v2536_v34 = vpop.f32.mrb[36].mxu0 }
 0x29c   :  { %v1576_v36 = vadd.f32 %v2536_v34, %v3638_v9  ;;  %v1570_v38 = vpop.f32.mrb[37].mxu0 }
 0x29d   :  { %v1571_v43 = vadd.f32 %v3638_v9, %v1570_v38 }
 0x29e   :  { %1874 = vst [vmem:[%s3904_s8 + $0x28] sm:$0xff] %v1576_v36 }
 0x29f   :  { %1873 = vst [vmem:[%s3904_s8 + $0x20] sm:$0xff] %v1571_v43  ;;  %v2539_v48 = vpop.f32.mrb[38].mxu0 }
 0x2a0   :  { %v1586_v51 = vadd.f32 %v2539_v48, %v3638_v9  ;;  %v1580_v54 = vpop.f32.mrb[39].mxu0 }
 0x2a1   :  { %v1581_v59 = vadd.f32 %v3638_v9, %v1580_v54 }
 0x2a2   :  { %1876 = vst [vmem:[%s3904_s8 + $0x38] sm:$0xff] %v1586_v51 }
 0x2a3   :  { %1875 = vst [vmem:[%s3904_s8 + $0x30] sm:$0xff] %v1581_v59  ;;  %v2542_v2 = vpop.f32.mrb[40].mxu0 }
 0x2a4   :  { %v1596_v4 = vadd.f32 %v2542_v2, %v3638_v9  ;;  %v1590_v7 = vpop.f32.mrb[41].mxu0 }
 0x2a5   :  { %v1591_v14 = vadd.f32 %v3638_v9, %v1590_v7 }
 0x2a6   :  { %1878 = vst [vmem:[%s3904_s8 + $0x48] sm:$0xff] %v1596_v4 }
 0x2a7   :  { %1877 = vst [vmem:[%s3904_s8 + $0x40] sm:$0xff] %v1591_v14  ;;  %v2545_v19 = vpop.f32.mrb[42].mxu0 }
 0x2a8   :  { %v1606_v22 = vadd.f32 %v2545_v19, %v3638_v9  ;;  %v1600_v26 = vpop.f32.mrb[43].mxu0 }
 0x2a9   :  { %v1601_v32 = vadd.f32 %v3638_v9, %v1600_v26 }
 0x2aa   :  { %1880 = vst [vmem:[%s3904_s8 + $0x58] sm:$0xff] %v1606_v22 }
 0x2ab   :  { %1879 = vst [vmem:[%s3904_s8 + $0x50] sm:$0xff] %v1601_v32  ;;  %v2548_v40 = vpop.f32.mrb[44].mxu0 }
 0x2ac   :  { %v1616_v42 = vadd.f32 %v2548_v40, %v3638_v9  ;;  %v1610_v45 = vpop.f32.mrb[45].mxu0 }
 0x2ad   :  { %v1611_v55 = vadd.f32 %v3638_v9, %v1610_v45 }
 0x2ae   :  { %1882 = vst [vmem:[%s3904_s8 + $0x68] sm:$0xff] %v1616_v42 }
 0x2af   :  { %1881 = vst [vmem:[%s3904_s8 + $0x60] sm:$0xff] %v1611_v55  ;;  %v2551_v62 = vpop.f32.mrb[46].mxu0 }
 0x2b0   :  { %v1626_v3 = vadd.f32 %v2551_v62, %v3638_v9  ;;  %v1620_v8 = vpop.f32.mrb[47].mxu0 }
 0x2b1   :  { %v1621_v16 = vadd.f32 %v3638_v9, %v1620_v8 }
 0x2b2   :  { %1884 = vst [vmem:[%s3904_s8 + $0x78] sm:$0xff] %v1626_v3 }
 0x2b3   :  { %1883 = vst [vmem:[%s3904_s8 + $0x70] sm:$0xff] %v1621_v16  ;;  %v2554_v27 = vpop.f32.mrb[48].mxu0 }
 0x2b4   :  { %v1636_v31 = vadd.f32 %v2554_v27, %v3638_v9  ;;  %v1630_v35 = vpop.f32.mrb[49].mxu0 }
 0x2b5   :  { %v1631_v47 = vadd.f32 %v3638_v9, %v1630_v35 }
 0x2b6   :  { %1886 = vst [vmem:[%s3904_s8 + $0x88] sm:$0xff] %v1636_v31 }
 0x2b7   :  { %1885 = vst [vmem:[%s3904_s8 + $0x80] sm:$0xff] %v1631_v47  ;;  %v2557_v58 = vpop.f32.mrb[50].mxu0 }
 0x2b8   :  { %v1646_v20 = vadd.f32 %v2557_v58, %v3638_v9  ;;  %v1640_v37 = vpop.f32.mrb[51].mxu0 }
 0x2b9   :  { %v1641_v18 = vadd.f32 %v3638_v9, %v1640_v37 }
 0x2ba   :  { %1888 = vst [vmem:[%s3904_s8 + $0x98] sm:$0xff] %v1646_v20 }
 0x2bb   :  { %1887 = vst [vmem:[%s3904_s8 + $0x90] sm:$0xff] %v1641_v18  ;;  %v2560_v41 = vpop.f32.mrb[52].mxu0 }
 0x2bc   :  { %v1656_v12 = vadd.f32 %v2560_v41, %v3638_v9  ;;  %v1650_v49 = vpop.f32.mrb[53].mxu0 }
 0x2bd   :  { %v1651_v60 = vadd.f32 %v3638_v9, %v1650_v49 }
 0x2be   :  { %1890 = vst [vmem:[%s3904_s8 + $0xa8] sm:$0xff] %v1656_v12 }
 0x2bf   :  { %1889 = vst [vmem:[%s3904_s8 + $0xa0] sm:$0xff] %v1651_v60  ;;  %v2563_v6 = vpop.f32.mrb[54].mxu0 }
 0x2c0   :  { %v1666_v44 = vadd.f32 %v2563_v6, %v3638_v9  ;;  %v1660_v15 = vpop.f32.mrb[55].mxu0 }
 0x2c1   :  { %v1661_v28 = vadd.f32 %v3638_v9, %v1660_v15 }
 0x2c2   :  { %1892 = vst [vmem:[%s3904_s8 + $0xb8] sm:$0xff] %v1666_v44 }
 0x2c3   :  { %1891 = vst [vmem:[%s3904_s8 + $0xb0] sm:$0xff] %v1661_v28  ;;  %v2566_v33 = vpop.f32.mrb[56].mxu0 }
 0x2c4   :  { %v1676_v10 = vadd.f32 %v2566_v33, %v3638_v9  ;;  %v1670_v52 = vpop.f32.mrb[57].mxu0 }
 0x2c5   :  { %v1671_v0 = vadd.f32 %v3638_v9, %v1670_v52 }
 0x2c6   :  { %1894 = vst [vmem:[%s3904_s8 + $0xc8] sm:$0xff] %v1676_v10 }
 0x2c7   :  { %1893 = vst [vmem:[%s3904_s8 + $0xc0] sm:$0xff] %v1671_v0  ;;  %v2569_v56 = vpop.f32.mrb[58].mxu0 }
 0x2c8   :  { %v1686_v24 = vadd.f32 %v2569_v56, %v3638_v9  ;;  %v1680_v30 = vpop.f32.mrb[59].mxu0 }
 0x2c9   :  { %v1681_v39 = vadd.f32 %v3638_v9, %v1680_v30 }
 0x2ca   :  { %1896 = vst [vmem:[%s3904_s8 + $0xd8] sm:$0xff] %v1686_v24 }
 0x2cb   :  { %1895 = vst [vmem:[%s3904_s8 + $0xd0] sm:$0xff] %v1681_v39  ;;  %v2572_v46 = vpop.f32.mrb[60].mxu0 }
 0x2cc   :  { %v1696_v50 = vadd.f32 %v2572_v46, %v3638_v9  ;;  %v1690_v53 = vpop.f32.mrb[61].mxu0 }
 0x2cd   :  { %v1691_v57 = vadd.f32 %v3638_v9, %v1690_v53 }
 0x2ce   :  { %1898 = vst [vmem:[%s3904_s8 + $0xe8] sm:$0xff] %v1696_v50 }
 0x2cf   :  { %1897 = vst [vmem:[%s3904_s8 + $0xe0] sm:$0xff] %v1691_v57  ;;  %v2575_v63 = vpop.f32.mrb[62].mxu0 }
 0x2d0   :  { %v1706_v1 = vadd.f32 %v2575_v63, %v3638_v9  ;;  %v1700_v5 = vpop.f32.mrb[63].mxu0 }
 0x2d1   :  { %v1701_v11 = vadd.f32 %v3638_v9, %v1700_v5 }
 0x2d2   :  { %1900 = vst [vmem:[%s3904_s8 + $0xf8] sm:$0xff] %v1706_v1 }
 0x2d3   :  { %1899 = vst [vmem:[%s3904_s8 + $0xf0] sm:$0xff] %v1701_v11  ;;  %v2578_v13 = vpop.f32.mrb[64].mxu0 }
 0x2d4   :  { %v1716_v17 = vadd.f32 %v2578_v13, %v3638_v9  ;;  %v1710_v61 = vpop.f32.mrb[65].mxu0 }
 0x2d5   :  { %v1711_v21 = vadd.f32 %v3638_v9, %v1710_v61 }
 0x2d6   :  { %1902 = vst [vmem:[%s3904_s8 + $0x108] sm:$0xff] %v1716_v17 }
 0x2d7   :  { %1901 = vst [vmem:[%s3904_s8 + $0x100] sm:$0xff] %v1711_v21  ;;  %v2581_v23 = vpop.f32.mrb[66].mxu0 }
 0x2d8   :  { %v1726_v25 = vadd.f32 %v2581_v23, %v3638_v9  ;;  %v1720_v29 = vpop.f32.mrb[67].mxu0 }
 0x2d9   :  { %v1721_v34 = vadd.f32 %v3638_v9, %v1720_v29 }
 0x2da   :  { %1904 = vst [vmem:[%s3904_s8 + $0x118] sm:$0xff] %v1726_v25 }
 0x2db   :  { %1903 = vst [vmem:[%s3904_s8 + $0x110] sm:$0xff] %v1721_v34  ;;  %v2584_v36 = vpop.f32.mrb[68].mxu0 }
 0x2dc   :  { %v1736_v38 = vadd.f32 %v2584_v36, %v3638_v9  ;;  %v1730_v43 = vpop.f32.mrb[69].mxu0 }
 0x2dd   :  { %v1731_v48 = vadd.f32 %v3638_v9, %v1730_v43 }
 0x2de   :  { %1906 = vst [vmem:[%s3904_s8 + $0x128] sm:$0xff] %v1736_v38 }
 0x2df   :  { %1905 = vst [vmem:[%s3904_s8 + $0x120] sm:$0xff] %v1731_v48  ;;  %v2587_v51 = vpop.f32.mrb[70].mxu0 }
 0x2e0   :  { %v1746_v54 = vadd.f32 %v2587_v51, %v3638_v9  ;;  %v1740_v59 = vpop.f32.mrb[71].mxu0 }
 0x2e1   :  { %v1741_v2 = vadd.f32 %v3638_v9, %v1740_v59 }
 0x2e2   :  { %1908 = vst [vmem:[%s3904_s8 + $0x138] sm:$0xff] %v1746_v54 }
 0x2e3   :  { %1907 = vst [vmem:[%s3904_s8 + $0x130] sm:$0xff] %v1741_v2  ;;  %v2590_v4 = vpop.f32.mrb[72].mxu0 }
 0x2e4   :  { %v1756_v7 = vadd.f32 %v2590_v4, %v3638_v9  ;;  %v1750_v14 = vpop.f32.mrb[73].mxu0 }
 0x2e5   :  { %v1751_v19 = vadd.f32 %v3638_v9, %v1750_v14 }
 0x2e6   :  { %1910 = vst [vmem:[%s3904_s8 + $0x148] sm:$0xff] %v1756_v7 }
 0x2e7   :  { %1909 = vst [vmem:[%s3904_s8 + $0x140] sm:$0xff] %v1751_v19  ;;  %v2593_v22 = vpop.f32.mrb[74].mxu0 }
 0x2e8   :  { %v1766_v26 = vadd.f32 %v2593_v22, %v3638_v9  ;;  %v1760_v32 = vpop.f32.mrb[75].mxu0 }
 0x2e9   :  { %v1761_v40 = vadd.f32 %v3638_v9, %v1760_v32 }
 0x2ea   :  { %1912 = vst [vmem:[%s3904_s8 + $0x158] sm:$0xff] %v1766_v26 }
 0x2eb   :  { %1911 = vst [vmem:[%s3904_s8 + $0x150] sm:$0xff] %v1761_v40  ;;  %v2596_v42 = vpop.f32.mrb[76].mxu0 }
 0x2ec   :  { %v1776_v45 = vadd.f32 %v2596_v42, %v3638_v9  ;;  %v1770_v55 = vpop.f32.mrb[77].mxu0 }
 0x2ed   :  { %v1771_v62 = vadd.f32 %v3638_v9, %v1770_v55 }
 0x2ee   :  { %1914 = vst [vmem:[%s3904_s8 + $0x168] sm:$0xff] %v1776_v45 }
 0x2ef   :  { %1913 = vst [vmem:[%s3904_s8 + $0x160] sm:$0xff] %v1771_v62  ;;  %v2599_v3 = vpop.f32.mrb[78].mxu0 }
 0x2f0   :  { %v1786_v8 = vadd.f32 %v2599_v3, %v3638_v9  ;;  %v1780_v16 = vpop.f32.mrb[79].mxu0 }
 0x2f1   :  { %v1781_v27 = vadd.f32 %v3638_v9, %v1780_v16 }
 0x2f2   :  { %1916 = vst [vmem:[%s3904_s8 + $0x178] sm:$0xff] %v1786_v8 }
 0x2f3   :  { %1915 = vst [vmem:[%s3904_s8 + $0x170] sm:$0xff] %v1781_v27  ;;  %v2602_v31 = vpop.f32.mrb[80].mxu0 }
 0x2f4   :  { %v1796_v35 = vadd.f32 %v2602_v31, %v3638_v9  ;;  %v1790_v47 = vpop.f32.mrb[81].mxu0 }
 0x2f5   :  { %v1791_v58 = vadd.f32 %v3638_v9, %v1790_v47 }
 0x2f6   :  { %1918 = vst [vmem:[%s3904_s8 + $0x188] sm:$0xff] %v1796_v35 }
 0x2f7   :  { %1917 = vst [vmem:[%s3904_s8 + $0x180] sm:$0xff] %v1791_v58  ;;  %v2605_v20 = vpop.f32.mrb[82].mxu0 }
 0x2f8   :  { %v1806_v37 = vadd.f32 %v2605_v20, %v3638_v9  ;;  %v1800_v18 = vpop.f32.mrb[83].mxu0 }
 0x2f9   :  { %v1801_v41 = vadd.f32 %v3638_v9, %v1800_v18 }
 0x2fa   :  { %1920 = vst [vmem:[%s3904_s8 + $0x198] sm:$0xff] %v1806_v37 }
 0x2fb   :  { %1919 = vst [vmem:[%s3904_s8 + $0x190] sm:$0xff] %v1801_v41  ;;  %v2608_v12 = vpop.f32.mrb[84].mxu0 }
 0x2fc   :  { %v1816_v49 = vadd.f32 %v2608_v12, %v3638_v9  ;;  %v1810_v60 = vpop.f32.mrb[85].mxu0 }
 0x2fd   :  { %v1811_v6 = vadd.f32 %v3638_v9, %v1810_v60 }
 0x2fe   :  { %1922 = vst [vmem:[%s3904_s8 + $0x1a8] sm:$0xff] %v1816_v49 }
 0x2ff   :  { %1921 = vst [vmem:[%s3904_s8 + $0x1a0] sm:$0xff] %v1811_v6  ;;  %v2611_v44 = vpop.f32.mrb[86].mxu0 }
 0x300   :  { %v1826_v15 = vadd.f32 %v2611_v44, %v3638_v9  ;;  %v1820_v28 = vpop.f32.mrb[87].mxu0 }
 0x301   :  { %v1821_v33 = vadd.f32 %v3638_v9, %v1820_v28 }
 0x302   :  { %1924 = vst [vmem:[%s3904_s8 + $0x1b8] sm:$0xff] %v1826_v15 }
 0x303   :  { %1923 = vst [vmem:[%s3904_s8 + $0x1b0] sm:$0xff] %v1821_v33  ;;  %v2614_v10 = vpop.f32.mrb[88].mxu0 }
 0x304   :  { %v1836_v52 = vadd.f32 %v2614_v10, %v3638_v9  ;;  %v1830_v0 = vpop.f32.mrb[89].mxu0 }
 0x305   :  { %v1831_v56 = vadd.f32 %v3638_v9, %v1830_v0 }
 0x306   :  { %1926 = vst [vmem:[%s3904_s8 + $0x1c8] sm:$0xff] %v1836_v52 }
 0x307   :  { %1925 = vst [vmem:[%s3904_s8 + $0x1c0] sm:$0xff] %v1831_v56  ;;  %v2617_v24 = vpop.f32.mrb[90].mxu0 }
 0x308   :  { %v1846_v30 = vadd.f32 %v2617_v24, %v3638_v9  ;;  %v1840_v39 = vpop.f32.mrb[91].mxu0 }
 0x309   :  { %v1841_v46 = vadd.f32 %v3638_v9, %v1840_v39 }
 0x30a   :  { %1928 = vst [vmem:[%s3904_s8 + $0x1d8] sm:$0xff] %v1846_v30 }
 0x30b   :  { %1927 = vst [vmem:[%s3904_s8 + $0x1d0] sm:$0xff] %v1841_v46  ;;  %v2620_v50 = vpop.f32.mrb[92].mxu0 }
 0x30c   :  { %v1856_v53 = vadd.f32 %v2620_v50, %v3638_v9  ;;  %v1850_v57 = vpop.f32.mrb[93].mxu0 }
 0x30d   :  { %v1851_v63 = vadd.f32 %v3638_v9, %v1850_v57 }
 0x30e   :  { %1930 = vst [vmem:[%s3904_s8 + $0x1e8] sm:$0xff] %v1856_v53 }
 0x30f   :  { %1929 = vst [vmem:[%s3904_s8 + $0x1e0] sm:$0xff] %v1851_v63  ;;  %v2623_v1 = vpop.f32.mrb[94].mxu0 }
 0x310   :  { %v1866_v5 = vadd.f32 %v2623_v1, %v3638_v9  ;;  %v1860_v11 = vpop.f32.mrb[95].mxu0 }
 0x311   :  { %v1861_v13 = vadd.f32 %v3638_v9, %v1860_v11 }
 0x312   :  { %1932 = vst [vmem:[%s3904_s8 + $0x1f8] sm:$0xff] %v1866_v5 }
 0x313   :  { %1931 = vst [vmem:[%s3904_s8 + $0x1f0] sm:$0xff] %v1861_v13 }

</bundles_post_ra>
